<compile_context>
chip_gen: v5e
topology: v5e:2x2
jax: 0.10.0
libtpu: 0.0.40
codegen_flags: <defaults>
</compile_context>

<pallas_src>
import jax
import jax.numpy as jnp
from jax.experimental import pallas as pl
from jax.experimental.pallas import tpu as pltpu


# ---------------------------------------------------------------------------
# Chip-aware policy helpers
# ---------------------------------------------------------------------------

def _vmem_capacity_bytes():
    try:
        return int(pltpu.get_tpu_info().vmem_capacity_bytes)
    except Exception:
        return 128 << 20  # v5e / v6e default


def _is_v5():
    try:
        return "v5" in jax.devices()[0].device_kind.lower()
    except Exception:
        return False


def _vmem_policy():
    """Returns (tile_budget_bytes, vmem_limit_clamp_bytes)."""
    cap = _vmem_capacity_bytes()
    if cap <= (64 << 20):                       # v7x: 64 MiB VMEM per TC
        return 40 << 20, max(cap - (8 << 20), 32 << 20)
    return 96 << 20, 112 << 20                  # v5e / v6e: 128 MiB VMEM


def _min_second_minor(dtype):
    isz = jnp.dtype(dtype).itemsize
    return {4: 8, 2: 16, 1: 32}.get(isz, 8)


def _block_q_candidates(Lq, dtype):
    min_b = _min_second_minor(dtype)
    prefer = (128, 64, 32, 16, 8) if _is_v5() else (256, 128, 64, 32, 16, 8)
    if Lq % 8 != 0:
        return [Lq]                             # only a full-extent block is legal
    cands = [t for t in prefer if min_b <= t <= Lq and Lq % t == 0]
    if not cands:
        return [Lq]
    if Lq <= max(prefer) and Lq not in cands:
        cands.insert(0, Lq)
    return cands


def _block_k_candidates(Lk):
    cands = [t for t in (2048, 1024, 512, 256, 128) if t <= Lk and Lk % t == 0]
    if Lk not in cands:
        cands.insert(0, Lk)                     # full K/V residency preferred
    return cands


# ---------------------------------------------------------------------------
# VMEM estimates (double-buffered block DMAs + f32 compiler intermediates)
# ---------------------------------------------------------------------------

def _single_pass_bytes(block_q, Lk, Dk, Dv, qkv_isz, mask_rows, mask_isz,
                       out_isz, attn_isz):
    buffered = (block_q * Dk * qkv_isz            # q tile
                + Lk * Dk * qkv_isz               # k (resident)
                + Lk * Dv * qkv_isz               # v (resident)
                + mask_rows * Lk * mask_isz       # mask tile (native dtype)
                + block_q * Dv * out_isz          # out tile
                + block_q * Lk * attn_isz)        # attn tile (optional)
    # f32 scores + exp(p) and the f32 output accumulator live as scratch.
    scratch = 2 * block_q * Lk * 4 + block_q * Dv * 4
    return 2 * buffered + scratch


def _flash_bytes(block_q, block_k, Dk, Dv, qkv_isz, mask_rows, mask_isz, out_isz):
    buffered = (block_q * Dk * qkv_isz
                + block_k * Dk * qkv_isz
                + block_k * Dv * qkv_isz
                + mask_rows * block_k * mask_isz
                + block_q * Dv * out_isz)
    scratch = (2 * block_q * block_k * 4          # f32 scores / probs
               + block_q * Dv * 4                 # f32 acc
               + 2 * block_q * 4)                 # m, l
    return 2 * buffered + scratch


# ---------------------------------------------------------------------------
# Kernels
# ---------------------------------------------------------------------------

def _make_single_pass_kernel(inv_temp, use_mask, min_mask_value):
    """Full-Lk scores in one shot; writes both output and attn probabilities."""

    def kernel(*refs):
        q_ref, k_ref, v_ref = refs[:3]
        nxt = 3
        mask_ref = None
        if use_mask:
            mask_ref = refs[nxt]
            nxt += 1
        out_ref, attn_ref = refs[nxt], refs[nxt + 1]

        # q / temperature on the (block_q, Dk) tile (matches the PyTorch module;
        # Lk/Dk fewer multiplies than scaling the (block_q, Lk) scores).
        q = q_ref[...] * inv_temp

        scores = jax.lax.dot_general(
            q, k_ref[...],
            dimension_numbers=(((1,), (1,)), ((), ())),
            preferred_element_type=jnp.float32)

        if use_mask:
            scores = jnp.where(mask_ref[...] != 0, scores,
                               jnp.float32(min_mask_value))

        scores = scores - jnp.max(scores, axis=-1, keepdims=True)
        p = jnp.exp(scores)
        inv_denom = pl.reciprocal(jnp.sum(p, axis=-1, keepdims=True),
                                  approx=False)

        # Normalize once; same tile feeds both the attn writeback and PV matmul.
        p_v = (p * inv_denom).astype(v_ref.dtype)
        attn_ref[...] = (p_v if attn_ref.dtype == v_ref.dtype
                         else p_v.astype(attn_ref.dtype))
        out = jax.lax.dot_general(
            p_v, v_ref[...],
            dimension_numbers=(((1,), (0,)), ((), ())),
            preferred_element_type=jnp.float32)
        out_ref[...] = out.astype(out_ref.dtype)

    return kernel


def _make_flash_kernel(inv_temp, use_mask, min_mask_value):
    """Lk-tiled online-softmax (flash) path: no attn writeback, no Lk VMEM cap."""

    def kernel(*refs):
        q_ref, k_ref, v_ref = refs[:3]
        nxt = 3
        mask_ref = None
        if use_mask:
            mask_ref = refs[nxt]
            nxt += 1
        out_ref = refs[nxt]
        m_ref, l_ref, acc_ref = refs[nxt + 1], refs[nxt + 2], refs[nxt + 3]

        j = pl.program_id(3)

        @pl.when(j == 0)
        def _():
            m_ref[...] = jnp.full_like(m_ref, -jnp.inf)
            l_ref[...] = jnp.zeros_like(l_ref)
            acc_ref[...] = jnp.zeros_like(acc_ref)

        q = q_ref[...] * inv_temp
        s = jax.lax.dot_general(
            q, k_ref[...],
            dimension_numbers=(((1,), (1,)), ((), ())),
            preferred_element_type=jnp.float32)
        if use_mask:
            s = jnp.where(mask_ref[...] != 0, s, jnp.float32(min_mask_value))

        m_prev = m_ref[...]
        m_new = jnp.maximum(m_prev, jnp.max(s, axis=-1, keepdims=True))
        alpha = jnp.exp(m_prev - m_new)
        p = jnp.exp(s - m_new)
        l_ref[...] = alpha * l_ref[...] + jnp.sum(p, axis=-1, keepdims=True)
        acc_ref[...] = alpha * acc_ref[...] + jax.lax.dot_general(
            p.astype(v_ref.dtype), v_ref[...],
            dimension_numbers=(((1,), (0,)), ((), ())),
            preferred_element_type=jnp.float32)
        m_ref[...] = m_new

        @pl.when(j == pl.num_programs(3) - 1)
        def _():
            out_ref[...] = (acc_ref[...]
                            * pl.reciprocal(l_ref[...], approx=False)
                            ).astype(out_ref.dtype)

    return kernel


# ---------------------------------------------------------------------------
# Wrapper
# ---------------------------------------------------------------------------

def scaled_dot_product_attention(q, k, v, mask=None, *, temperature,
                                 return_attn=True, attn_dtype=None,
                                 block_q=None, block_k=None):
    """q,k,v: (B, H, L, D). mask: (B|1, H|1, Lq|1, Lk), nonzero = keep."""
    B, H, Lq, Dk = q.shape
    Lk = k.shape[2]
    Dv = v.shape[-1]
    use_mask = mask is not None

    # Matches the PyTorch module's fp16 special case.
    min_mask_value = -65504.0 if q.dtype == jnp.float16 else -1.0e9
    inv_temp = 1.0 / float(temperature)

    qkv_isz = jnp.dtype(q.dtype).itemsize
    out_isz = qkv_isz
    if attn_dtype is None:
        attn_dtype = q.dtype
    attn_isz = jnp.dtype(attn_dtype).itemsize if return_attn else 0
    mask_isz = jnp.dtype(mask.dtype).itemsize if use_mask else 0

    if use_mask:
        mB, mH, mLq, mLk = mask.shape
        assert mLk == Lk and mLq in (1, Lq) and mH in (1, H) and mB in (1, B)
    else:
        mB = mH = mLq = 0

    budget, clamp_hi = _vmem_policy()
    bq_cands = [block_q] if block_q is not None else _block_q_candidates(Lq, q.dtype)

    if return_attn:
        # ---------- single-pass path (full-Lk scores + attn writeback) --------
        chosen_bq = bq_cands[-1]
        est = None
        for t in bq_cands:
            mrows = (t if mLq == Lq else 1) if use_mask else 0
            est = _single_pass_bytes(t, Lk, Dk, Dv, qkv_isz, mrows, mask_isz,
                                     out_isz, attn_isz)
            if est <= budget:
                chosen_bq = t
                break
        else:
            mrows = (chosen_bq if mLq == Lq else 1) if use_mask else 0
            est = _single_pass_bytes(chosen_bq, Lk, Dk, Dv, qkv_isz, mrows,
                                     mask_isz, out_isz, attn_isz)
        bq = chosen_bq

        grid = (B, H, pl.cdiv(Lq, bq))
        in_specs = [
            pl.BlockSpec((None, None, bq, Dk), lambda b, h, i: (b, h, i, 0)),
            pl.BlockSpec((None, None, Lk, Dk), lambda b, h, i: (b, h, 0, 0)),
            pl.BlockSpec((None, None, Lk, Dv), lambda b, h, i: (b, h, 0, 0)),
        ]
        inputs = [q, k, v]
        if use_mask:
            mq_blk = bq if mLq == Lq else 1

            def mask_map(b, h, i, _mB=mB, _mH=mH, _mLq=mLq):
                return (b if _mB != 1 else 0, h if _mH != 1 else 0,
                        i if _mLq != 1 else 0, 0)

            in_specs.append(pl.BlockSpec((None, None, mq_blk, Lk), mask_map))
            inputs.append(mask)  # native dtype; `!= 0` is tested in-kernel

        out_specs = [
            pl.BlockSpec((None, None, bq, Dv), lambda b, h, i: (b, h, i, 0)),
            pl.BlockSpec((None, None, bq, Lk), lambda b, h, i: (b, h, i, 0)),
        ]
        out_shapes = (jax.ShapeDtypeStruct((B, H, Lq, Dv), q.dtype),
                      jax.ShapeDtypeStruct((B, H, Lq, Lk), attn_dtype))
        scratch_shapes = []
        kernel = _make_single_pass_kernel(inv_temp, use_mask, min_mask_value)
        dim_sem = ("parallel", "parallel", "arbitrary")
    else:
        # ---------- flash path (Lk-tiled online softmax, no attn writeback) ---
        bk_cands = [block_k] if block_k is not None else _block_k_candidates(Lk)
        if block_k is not None:
            assert Lk % block_k == 0, "user-supplied block_k must divide Lk"
        chosen = None
        for t in bq_cands:
            mrows = (t if mLq == Lq else 1) if use_mask else 0
            for bk_ in bk_cands:
                est = _flash_bytes(t, bk_, Dk, Dv, qkv_isz, mrows, mask_isz,
                                   out_isz)
                if est <= budget:
                    chosen = (t, bk_, est)
                    break
            if chosen is not None:
                break
        if chosen is None:
            t, bk_ = bq_cands[-1], bk_cands[-1]
            mrows = (t if mLq == Lq else 1) if use_mask else 0
            chosen = (t, bk_, _flash_bytes(t, bk_, Dk, Dv, qkv_isz, mrows,
                                           mask_isz, out_isz))
        bq, bk, est = chosen

        grid = (B, H, pl.cdiv(Lq, bq), Lk // bk)
        in_specs = [
            pl.BlockSpec((None, None, bq, Dk), lambda b, h, i, j: (b, h, i, 0)),
            pl.BlockSpec((None, None, bk, Dk), lambda b, h, i, j: (b, h, j, 0)),
            pl.BlockSpec((None, None, bk, Dv), lambda b, h, i, j: (b, h, j, 0)),
        ]
        inputs = [q, k, v]
        if use_mask:
            mq_blk = bq if mLq == Lq else 1

            def mask_map(b, h, i, j, _mB=mB, _mH=mH, _mLq=mLq):
                return (b if _mB != 1 else 0, h if _mH != 1 else 0,
                        i if _mLq != 1 else 0, j)

            in_specs.append(pl.BlockSpec((None, None, mq_blk, bk), mask_map))
            inputs.append(mask)

        out_specs = [pl.BlockSpec((None, None, bq, Dv),
                                  lambda b, h, i, j: (b, h, i, 0))]
        out_shapes = (jax.ShapeDtypeStruct((B, H, Lq, Dv), q.dtype),)
        scratch_shapes = [pltpu.VMEM((bq, 1), jnp.float32),
                          pltpu.VMEM((bq, 1), jnp.float32),
                          pltpu.VMEM((bq, Dv), jnp.float32)]
        kernel = _make_flash_kernel(inv_temp, use_mask, min_mask_value)
        dim_sem = ("parallel", "parallel", "arbitrary", "arbitrary")

    vmem_limit = int(min(max(est + (8 << 20), 32 << 20), clamp_hi))

    grid_spec = pltpu.PrefetchScalarGridSpec(
        num_scalar_prefetch=0,
        grid=grid,
        in_specs=in_specs,
        out_specs=out_specs,
        scratch_shapes=scratch_shapes,
    )

    results = pl.pallas_call(
        kernel,
        out_shape=out_shapes,
        grid_spec=grid_spec,
        compiler_params=pltpu.CompilerParams(
            dimension_semantics=dim_sem,
            vmem_limit_bytes=vmem_limit,
        ),
    )(*inputs)

    if return_attn:
        return results
    return results[0]


# ---------------------------------------------------------------------------
# Reference + self-test
# ---------------------------------------------------------------------------

def reference(q, k, v, mask, temperature):
    attn = jnp.einsum("bhqd,bhkd->bhqk", q / temperature, k)
    if mask is not None:
        attn = jnp.where(mask == 0, -1e9, attn)
    attn = jax.nn.softmax(attn, axis=-1)
    out = jnp.einsum("bhqk,bhkd->bhqd", attn, v)
    return out, attn


if __name__ == "__main__":
    key = jax.random.PRNGKey(0)

    # --- Test 1: full path (output + attn probabilities), lane-dense shapes ---
    B, H, Lq, Lk, Dk, Dv = 2, 4, 128, 128, 128, 128
    temperature = float(Dk) ** 0.5
    kq, kk, kv, km, k2 = jax.random.split(key, 5)
    q = jax.random.normal(kq, (B, H, Lq, Dk), dtype=jnp.float32)
    k = jax.random.normal(kk, (B, H, Lk, Dk), dtype=jnp.float32)
    v = jax.random.normal(kv, (B, H, Lk, Dv), dtype=jnp.float32)
    # Binary mask, 1 = keep, 0 = masked out (broadcast over heads), native f32.
    mask = (jax.random.uniform(km, (B, 1, Lq, Lk)) > 0.2).astype(jnp.float32)

    out, attn = scaled_dot_product_attention(q, k, v, mask,
                                             temperature=temperature)
    out = jax.block_until_ready(out)
    attn = jax.block_until_ready(attn)
    ref_out, ref_attn = reference(q, k, v, mask, temperature)
    assert jnp.allclose(out, ref_out, atol=2e-5, rtol=2e-5), "output mismatch"
    assert jnp.allclose(attn, ref_attn, atol=2e-5, rtol=2e-5), "attn mismatch"

    # --- Test 2: inference path (flash / online-softmax), same shapes ---------
    out_only = scaled_dot_product_attention(q, k, v, mask,
                                            temperature=temperature,
                                            return_attn=False)
    out_only = jax.block_until_ready(out_only)
    assert jnp.allclose(out_only, ref_out, atol=2e-5, rtol=2e-5), \
        "out-only mismatch"

    # --- Test 3: flash path with actual Lk tiling (2 key blocks) --------------
    B2, H2, Lq2, Lk2 = 2, 2, 128, 256
    kq2, kk2, kv2, km2 = jax.random.split(k2, 4)
    q2 = jax.random.normal(kq2, (B2, H2, Lq2, Dk), dtype=jnp.float32)
    k2_ = jax.random.normal(kk2, (B2, H2, Lk2, Dk), dtype=jnp.float32)
    v2 = jax.random.normal(kv2, (B2, H2, Lk2, Dv), dtype=jnp.float32)
    mask2 = (jax.random.uniform(km2, (B2, 1, Lq2, Lk2)) > 0.2).astype(jnp.float32)

    out2 = scaled_dot_product_attention(q2, k2_, v2, mask2,
                                        temperature=temperature,
                                        return_attn=False, block_k=128)
    out2 = jax.block_until_ready(out2)
    ref_out2, _ = reference(q2, k2_, v2, mask2, temperature)
    assert jnp.allclose(out2, ref_out2, atol=2e-5, rtol=2e-5), \
        "flash-tiled mismatch"

    print("KERNEL_OK")
</pallas_src>

<mosaic_0001>
module attributes {stable_mosaic.version = 11 : i64} {
  func.func @kernel(%arg0: i32, %arg1: i32, %arg2: i32, %arg3: memref<1x1x128x128xf32, #tpu.memory_space<vmem>>, %arg4: memref<1x1x128x128xf32, #tpu.memory_space<vmem>>, %arg5: memref<1x1x128x128xf32, #tpu.memory_space<vmem>>, %arg6: memref<1x1x128x128xf32, #tpu.memory_space<vmem>>, %arg7: memref<1x1x128x128xf32, #tpu.memory_space<vmem>>, %arg8: memref<1x1x128x128xf32, #tpu.memory_space<vmem>>) attributes {dimension_semantics = [#tpu.dimension_semantics<parallel>, #tpu.dimension_semantics<parallel>, #tpu.dimension_semantics<arbitrary>], iteration_bounds = array<i64: 2, 4, 1>, scalar_prefetch = 0 : i64, scratch_operands = 0 : i64, tpu.core_type = #tpu.core_type<tc>, window_params = [{transform_indices = @transform_0, window_bounds = array<i64: 1, 1, 128, 128>}, {transform_indices = @transform_1, window_bounds = array<i64: 1, 1, 128, 128>}, {transform_indices = @transform_2, window_bounds = array<i64: 1, 1, 128, 128>}, {transform_indices = @transform_3, window_bounds = array<i64: 1, 1, 128, 128>}, {transform_indices = @transform_4, window_bounds = array<i64: 1, 1, 128, 128>}, {transform_indices = @transform_5, window_bounds = array<i64: 1, 1, 128, 128>}]} {
    %c0 = arith.constant 0 : index
    %c0_0 = arith.constant 0 : index
    %c0_1 = arith.constant 0 : index
    %c0_2 = arith.constant 0 : index
    %0 = vector.load %arg3[%c0, %c0_0, %c0_1, %c0_2] : memref<1x1x128x128xf32, #tpu.memory_space<vmem>>, vector<1x1x128x128xf32>
    %1 = vector.shape_cast %0 : vector<1x1x128x128xf32> to vector<128x128xf32>
    %cst = arith.constant 0.0883883461 : f32
    %2 = vector.broadcast %cst : f32 to vector<128x128xf32>
    %3 = arith.mulf %1, %2 : vector<128x128xf32>
    %c0_3 = arith.constant 0 : index
    %c0_4 = arith.constant 0 : index
    %c0_5 = arith.constant 0 : index
    %c0_6 = arith.constant 0 : index
    %4 = vector.load %arg4[%c0_3, %c0_4, %c0_5, %c0_6] : memref<1x1x128x128xf32, #tpu.memory_space<vmem>>, vector<1x1x128x128xf32>
    %5 = vector.shape_cast %4 : vector<1x1x128x128xf32> to vector<128x128xf32>
    %cst_7 = arith.constant dense<0.000000e+00> : vector<128x128xf32>
    %6 = tpu.matmul %3, %5, %cst_7 {dimension_numbers = #tpu.dot_dimension_numbers<[1], [1], [0], [0], [0, 0, 1, 0], [], []>} : vector<128x128xf32>, vector<128x128xf32>, vector<128x128xf32> -> vector<128x128xf32>
    %c0_8 = arith.constant 0 : index
    %c0_9 = arith.constant 0 : index
    %c0_10 = arith.constant 0 : index
    %c0_11 = arith.constant 0 : index
    %7 = vector.load %arg6[%c0_8, %c0_9, %c0_10, %c0_11] : memref<1x1x128x128xf32, #tpu.memory_space<vmem>>, vector<1x1x128x128xf32>
    %8 = vector.shape_cast %7 : vector<1x1x128x128xf32> to vector<128x128xf32>
    %cst_12 = arith.constant 0.000000e+00 : f32
    %9 = vector.broadcast %cst_12 : f32 to vector<128x128xf32>
    %10 = arith.cmpf one, %8, %9 : vector<128x128xf32>
    %cst_13 = arith.constant -1.000000e+09 : f32
    %11 = vector.broadcast %cst_13 : f32 to vector<128x128xf32>
    %12 = arith.select %10, %6, %11 : vector<128x128xi1>, vector<128x128xf32>
    %cst_14 = arith.constant dense<0xFF800000> : vector<128xf32>
    %13 = vector.multi_reduction <maximumf>, %12, %cst_14 [1] : vector<128x128xf32> to vector<128xf32>
    %14 = vector.shape_cast %13 : vector<128xf32> to vector<128x1xf32>
    %15 = vector.broadcast %14 : vector<128x1xf32> to vector<128x128xf32>
    %16 = arith.subf %12, %15 : vector<128x128xf32>
    %17 = math.exp %16 : vector<128x128xf32>
    %cst_15 = arith.constant dense<0.000000e+00> : vector<128xf32>
    %18 = vector.multi_reduction <add>, %17, %cst_15 [1] : vector<128x128xf32> to vector<128xf32>
    %19 = vector.shape_cast %18 : vector<128xf32> to vector<128x1xf32>
    %20 = tpu.reciprocal %19 : vector<128x1xf32> -> vector<128x1xf32>
    %21 = vector.broadcast %20 : vector<128x1xf32> to vector<128x128xf32>
    %22 = arith.mulf %17, %21 : vector<128x128xf32>
    %c0_16 = arith.constant 0 : index
    %c0_17 = arith.constant 0 : index
    %c0_18 = arith.constant 0 : index
    %c0_19 = arith.constant 0 : index
    %23 = vector.load %arg8[%c0_16, %c0_17, %c0_18, %c0_19] : memref<1x1x128x128xf32, #tpu.memory_space<vmem>>, vector<1x1x128x128xf32>
    %24 = vector.shape_cast %23 : vector<1x1x128x128xf32> to vector<128x128xf32>
    %25 = vector.shape_cast %22 : vector<128x128xf32> to vector<1x1x128x128xf32>
    tpu.vector_store %arg8[%c0_16, %c0_17, %c0_18, %c0_19], %25 {strides = array<i32>} : memref<1x1x128x128xf32, #tpu.memory_space<vmem>>, vector<1x1x128x128xf32>,
    %c0_20 = arith.constant 0 : index
    %c0_21 = arith.constant 0 : index
    %c0_22 = arith.constant 0 : index
    %c0_23 = arith.constant 0 : index
    %26 = vector.load %arg5[%c0_20, %c0_21, %c0_22, %c0_23] : memref<1x1x128x128xf32, #tpu.memory_space<vmem>>, vector<1x1x128x128xf32>
    %27 = vector.shape_cast %26 : vector<1x1x128x128xf32> to vector<128x128xf32>
    %cst_24 = arith.constant dense<0.000000e+00> : vector<128x128xf32>
    %28 = tpu.matmul %22, %27, %cst_24 {dimension_numbers = #tpu.dot_dimension_numbers<[1], [0], [0], [1], [0, 0, 1, 1], [], []>} : vector<128x128xf32>, vector<128x128xf32>, vector<128x128xf32> -> vector<128x128xf32>
    %c0_25 = arith.constant 0 : index
    %c0_26 = arith.constant 0 : index
    %c0_27 = arith.constant 0 : index
    %c0_28 = arith.constant 0 : index
    %29 = vector.load %arg7[%c0_25, %c0_26, %c0_27, %c0_28] : memref<1x1x128x128xf32, #tpu.memory_space<vmem>>, vector<1x1x128x128xf32>
    %30 = vector.shape_cast %29 : vector<1x1x128x128xf32> to vector<128x128xf32>
    %31 = vector.shape_cast %28 : vector<128x128xf32> to vector<1x1x128x128xf32>
    tpu.vector_store %arg7[%c0_25, %c0_26, %c0_27, %c0_28], %31 {strides = array<i32>} : memref<1x1x128x128xf32, #tpu.memory_space<vmem>>, vector<1x1x128x128xf32>,
    return
  }
  func.func @transform_0(%arg0: i32, %arg1: i32, %arg2: i32) -> (i32, i32, i32, i32) {
    %c0_i32 = arith.constant 0 : i32
    %c0_i32_0 = arith.constant 0 : i32
    return %arg0, %arg1, %arg2, %c0_i32 : i32, i32, i32, i32
  }
  func.func @transform_1(%arg0: i32, %arg1: i32, %arg2: i32) -> (i32, i32, i32, i32) {
    %c0_i32 = arith.constant 0 : i32
    %c0_i32_0 = arith.constant 0 : i32
    %c0_i32_1 = arith.constant 0 : i32
    return %arg0, %arg1, %c0_i32, %c0_i32_0 : i32, i32, i32, i32
  }
  func.func @transform_2(%arg0: i32, %arg1: i32, %arg2: i32) -> (i32, i32, i32, i32) {
    %c0_i32 = arith.constant 0 : i32
    %c0_i32_0 = arith.constant 0 : i32
    %c0_i32_1 = arith.constant 0 : i32
    return %arg0, %arg1, %c0_i32, %c0_i32_0 : i32, i32, i32, i32
  }
  func.func @transform_3(%arg0: i32, %arg1: i32, %arg2: i32) -> (i32, i32, i32, i32) {
    %c0_i32 = arith.constant 0 : i32
    %c0_i32_0 = arith.constant 0 : i32
    %c0_i32_1 = arith.constant 0 : i32
    return %arg0, %c0_i32, %arg2, %c0_i32_0 : i32, i32, i32, i32
  }
  func.func @transform_4(%arg0: i32, %arg1: i32, %arg2: i32) -> (i32, i32, i32, i32) {
    %c0_i32 = arith.constant 0 : i32
    %c0_i32_0 = arith.constant 0 : i32
    return %arg0, %arg1, %arg2, %c0_i32 : i32, i32, i32, i32
  }
  func.func @transform_5(%arg0: i32, %arg1: i32, %arg2: i32) -> (i32, i32, i32, i32) {
    %c0_i32 = arith.constant 0 : i32
    %c0_i32_0 = arith.constant 0 : i32
    return %arg0, %arg1, %arg2, %c0_i32 : i32, i32, i32, i32
  }
}

</mosaic_0001>

<bundles_post_ra>
// kernel: tpu_custom_call.1
= control target key start
LH: loop header
LB: loop body
LE: loop exit
PB: predicated region body
PF: predicated region fallthrough
CT: control target
= control target key end

     0   :  { %s2574_s0 = inlined_call_operand.hbm [shape: f32[2,4,128,128], index: 0, kind: input, shape index: {}]   ;;  %s2575_s1 = inlined_call_operand.hbm [shape: f32[2,4,128,128], index: 1, kind: input, shape index: {}]   ;;  %s2576_s2 = inlined_call_operand.hbm [shape: f32[2,4,128,128], index: 2, kind: input, shape index: {}]   ;;  %s2577_s3 = inlined_call_operand.hbm [shape: f32[2,1,128,128], index: 3, kind: input, shape index: {}]   ;;  %s2578_s4 = inlined_call_operand.hbm [shape: f32[2,4,128,128], index: 4, kind: output, shape index: {0}]   ;;  %s2579_s5 = inlined_call_operand.hbm [shape: f32[2,4,128,128], index: 5, kind: output, shape index: {1}]  }
   0x1   :  { %2587 = sst [smem:[#allocation24_spill]] %s2574_s0 }
   0x2   :  { %2588 = sst [smem:[#allocation25_spill]] %s2575_s1 }
   0x3   :  { %2589 = sst [smem:[#allocation26_spill]] %s2578_s4 }
   0x4   :  { %2590 = sst [smem:[#allocation27_spill]] %s2579_s5 }
   0x5   :  { %11 = vsyncpa [#allocation3], 0 }
   0x6   :  { %13 = vsyncpa [#allocation3 + $0x1], 0 }
   0x7   :  { %14 = vsyncpa [#allocation6], 0 }
   0x8   :  { %16 = vsyncpa [#allocation6 + $0x1], 0 }
   0x9   :  { %17 = vsyncpa [#allocation9], 0 }
   0xa   :  { %19 = vsyncpa [#allocation9 + $0x1], 0 }
   0xb   :  { %20 = vsyncpa [#allocation4], 0 }
   0xc   :  { %22 = vsyncpa [#allocation4 + $0x1], 0 }
   0xd   :  { %23 = vsyncpa [#allocation12], 0 }
   0xe   :  { %25 = vsyncpa [#allocation12 + $0x1], 0  ;;  %s1921_s18 = smov 0   ;;  %s1923_s19 = smov 0  }
   0xf   :  { %s1925_s20 = smov 0   ;;  %s1927_s21 = smov 0  }
  0x10   :  { %s1929_s22 = smov 0   ;;  %s1931_s23 = smov 0  }
  0x11   :  { %s1933_s24 = smov 0   ;;  %s1935_s25 = smov 0  }
  0x12   :  { %s1937_s26 = smov 0   ;;  %s1939_s27 = smov 0  }
  0x13   :  { %s1941_s28 = smov 0  }
  0x14 LB: > { %2591 = sst [smem:[#allocation18_spill]] %s1865_s23  ;;  %s1977_s29 = sadd.s32 4294967295, %s1885_s28   ;;  %s1885_s28 = sphi %s1941_s28, %s31_s28   ;;  %s1881_s27 = sphi %s1939_s27, %s2632_s27   ;;  %s1877_s26 = sphi %s1937_s26, %s2624_s26   ;;  %s1873_s25 = sphi %s1935_s25, %s2631_s25   ;;  %s1869_s24 = sphi %s1933_s24, %s2623_s24   ;;  %s1865_s23 = sphi %s1931_s23, %s2622_s23   ;;  %s1861_s22 = sphi %s1929_s22, %s2630_s22   ;;  %s1857_s21 = sphi %s1927_s21, %s2629_s21   ;;  %s1853_s20 = sphi %s1925_s20, %s2628_s20   ;;  %s1849_s19 = sphi %s1923_s19, %s2627_s19   ;;  %s1845_s18 = sphi %s1921_s18, %s2626_s18  }
  0x15   : > { %2592 = sst [smem:[#allocation19_spill]] %s1877_s26  ;;  %s1313_s30 = sadd.s32 4294967294, %s1885_s28  }
  0x16   : > { %s46_s6 = sadd.s32 1, %s1877_s26  ;;  %s50_s7 = sadd.s32 1, %s1881_s27 }
  0x17   : > { %p48_p0 = scmp.ge.s32.totalorder %s46_s6, 4  ;;  %s61_s8 = sadd.s32 1, %s1865_s23 }
  0x18   : > { %p68_p1 = scmp.ne.s32.totalorder %s1865_s23, %s1861_s22  ;;  %p69_p2 = scmp.eq.s32.totalorder %s1885_s28, 0 }
  0x19   : > { %s2634_s6 = smov (%p48_p0, %s46_s6), 0  ;;  %s2636_s7 = smov (!%p48_p0, %s50_s7), %s1881_s27 }
  0x1a   : > { %2593 = sst [smem:[#allocation20_spill]] %s2634_s6  ;;  %s55_s9 = ssub.s32 %s1877_s26, %s2634_s6 }
  0x1b   : > { %p1993_p3 = por %p69_p2, %p68_p1  ;;  %p52_p4 = scmp.ge.s32.totalorder %s2636_s7, 2 }
  0x1c   : > { %p74_p5 = scmp.ne.s32.totalorder %s1861_s22, %s1857_s21  ;;  %p186_p6 = scmp.eq.s32.totalorder %s1977_s29, 7 }
  0x1d   : > { %p192_p7 = scmp.eq.s32.totalorder %s1313_s30, 7  ;;  %s2638_s7 = smov (%p52_p4, %s2636_s7), 0 }
  0x1e   : > { %2595 = sst [smem:[#allocation21_spill]] %s2638_s7  ;;  %p2002_p8 = por %p186_p6, %p68_p1 }
  0x1f   : > { %p2009_p9 = por %p192_p7, %p74_p5  ;;  %s2015_s13 = ssub.s32 %s1881_s27, %s2638_s7 }
  0x20   : > { %s56_s14 = sor.u32 %s55_s9, %s2015_s13  ;;  %p143_p10 = scmp.eq.s32.totalorder %s2015_s13, 0 }
  0x21   : > { %s2597_s12 = scalar_select %p2009_p9, 1, 0 }
  0x22   : > { %p59_p11 = scmp.eq.s32.totalorder %s56_s14, 0  ;;  %p1445_p12 = scmp.lt.s32.totalorder %s1885_s28, 8 }
  0x23   : > { %2598 = sst [smem:[#allocation22_spill]] %s2597_s12  ;;  %s242_s15 = sand.u32 1, %s1865_s23  }
  0x24   : > { %s1317_s16 = sshll.u32 %s1877_s26, 4  ;;  %s2025_s30 = sshll.u32 %s242_s15, 7 }
  0x25   : > { %s2023_s17 = scalar_select %p59_p11, %s1865_s23, %s61_s8  }
  0x26   : > { %s1318_s6 = sshll.u32 %s1881_s27, 6  ;;  %p2032_p13 = pnand %p1445_p12, %p1993_p3 }
  0x27   : > { %2599 = sst [smem:[#allocation23_spill]] %s2023_s17  ;;  %s253_s4 = sadd.s32 %s1318_s6, %s1317_s16 }
  0x28   : > { %s1319_s9 = sshll.u32 %s253_s4, 3  ;;  %s268_s14 = sand.u32 1, %s1885_s28  }
  0x29   : > { %s2601_s1 = sld [smem:[#allocation25_spill]]  ;;  %s272_s23 = scalar_lea.vmem [#allocation5], %s2025_s30 }
  0x2a   : > { %s282_s5 = sshll.u32 %s272_s23, 4  ;;  %s269_s6 = scalar_lea.sflag [#allocation6], %s268_s14  ;;  %s283_s5 = int_to_ptr.vmem [resolvable:$true] %s282_s5 }
  0x2b   : > { %s1887_s10 = smov 128   ;;  %s1888_s16 = smov 8  }
  0x2c   : > { %p1331_p0 = scmp.ge.s32.totalorder %s1885_s28, 1  ;;  %p338_p1 = scmp.lt.s32.totalorder %s1885_s28, 9 }
  0x2d   : > { %s2603_s0 = sld [smem:[#allocation24_spill]]  ;;  %p75_p4 = scmp.eq.s32.totalorder %s1977_s29, 0 }
  0x2e   : > { %p2048_p3 = pnand %p1331_p0, %p338_p1  ;;  %p152_p7 = scmp.ne.s32.totalorder %s1853_s20, %s1849_s19 }
  0x2f   : > { %s279_s8 = scalar_lea.hbm %s2601_s1, %s1319_s9  ;;  %p2080_p6 = por %p75_p4, %p74_p5 }
  0x30   : > { %s280_s17 = sshll.u32 %s279_s8, 4  ;;  %s246_s8 = scalar_lea.vmem [#allocation2], %s2025_s30  ;;  %s281_s17 = int_to_ptr.hbm [resolvable:$true] %s280_s17 }
  0x31   : > { %1431 = dma.hbm_to_vmem [thread:$0]  (!%p2032_p13), %s281_s17, 2048, %s283_s5, %s269_s6, %s1887_s10, %s1887_s10, %s1888_s16  }
  0x32   : > { %s258_s5 = sshll.u32 %s246_s8, 4  ;;  %s243_s17 = scalar_lea.sflag [#allocation3], %s242_s15  ;;  %s259_s5 = int_to_ptr.vmem [resolvable:$true] %s258_s5 }
  0x33   : > { %s255_s12 = scalar_lea.hbm %s2603_s0, %s1319_s9  ;;  %s296_s8 = scalar_lea.vmem [#allocation7], %s2025_s30 }
  0x34   : > { %s256_s14 = sshll.u32 %s255_s12, 4  ;;  %s303_s12 = scalar_lea.hbm %s2576_s2, %s1319_s9  ;;  %s257_s14 = int_to_ptr.hbm [resolvable:$true] %s256_s14 }
  0x35   : > { %1428 = dma.hbm_to_vmem [thread:$0]  (!%p2032_p13), %s257_s14, 2048, %s259_s5, %s243_s17, %s1887_s10, %s1887_s10, %s1888_s16  }
  0x36   : > { %s304_s0 = sshll.u32 %s303_s12, 4  ;;  %s306_s1 = sshll.u32 %s296_s8, 4  ;;  %s305_s0 = int_to_ptr.hbm [resolvable:$true] %s304_s0  ;;  %s307_s1 = int_to_ptr.vmem [resolvable:$true] %s306_s1 }
  0x37   : > { %1434 = dma.hbm_to_vmem [thread:$0]  (!%p2032_p13), %s305_s0, 2048, %s307_s1, %s269_s6, %s1887_s10, %s1887_s10, %s1888_s16  }
  0x38   : > { %s145_s15 = sadd.s32 1, %s1853_s20  ;;  %p158_p11 = scmp.ne.s32.totalorder %s1849_s19, %s1845_s18 }
  0x39   : > { %s2075_s14 = scalar_select %p143_p10, %s1853_s20, %s145_s15  }
  0x3a   : > { %s316_s30 = sand.u32 1, %s1853_s20   ;;  %p154_p0 = por %p152_p7, %p69_p2 }
  0x3b   : > { %p2091_p1 = por %p158_p11, %p75_p4  ;;  %s1328_s0 = sshll.u32 %s316_s30, 7 }
  0x3c   : > { %s1348_s1 = sshll.u32 %s1881_s27, 7  ;;  %s320_s17 = scalar_lea.vmem [#allocation8], %s1328_s0 }
  0x3d   : > { %s327_s5 = scalar_lea.hbm %s2577_s3, %s1348_s1  ;;  %s330_s23 = sshll.u32 %s320_s17, 4  ;;  %s331_s23 = int_to_ptr.vmem [resolvable:$true] %s330_s23 }
  0x3e   : > { %s328_s26 = sshll.u32 %s327_s5, 4  ;;  %p1435_p5 = pnand %p1445_p12, %p154_p0  ;;  %s329_s26 = int_to_ptr.hbm [resolvable:$true] %s328_s26 }
  0x3f   : > { %s317_s18 = scalar_lea.sflag [#allocation9], %s316_s30  ;;  %342 = sbr.rel (%p2048_p3) target bundleno = 833 (0x341), region = 36 }
  0x40   : > { %1437 = dma.hbm_to_vmem [thread:$0]  (!%p1435_p5), %s329_s26, 2048, %s331_s23, %s317_s18, %s1887_s10, %s1887_s10, %s1888_s16  }
  0x41   : > { %s2107_s12 = sand.u32 (!%p2048_p3), 1, %s1861_s22  }
  0x42   : > { %s2110_s8 = sshll.u32 (!%p2048_p3), %s2107_s12, 7  ;;  %s345_s15 = scalar_lea.sflag (!%p2048_p3), [#allocation3], %s2107_s12 }
  0x43   : > { %s2114_s0 = scalar_lea.vmem (!%p2048_p3), [#allocation2], %s2110_s8 }
  0x44   : > { %1824 = dma.done.wait (%p2080_p6), %s345_s15, 2048  }
  0x45   : > { %1826 = vsyncadd (%p2080_p6), %s345_s15, 4294965248  ;;  %s354_s10 = sand.u32 1, %s1977_s29   ;;  %s2122_s4 = scalar_lea.vmem [#allocation5], %s2110_s8 }
  0x46   : > { %s355_s16 = scalar_lea.sflag [#allocation6], %s354_s10 }
  0x47   : > { %1828 = dma.done.wait (%p2080_p6), %s355_s16, 4096  }
  0x48   : > { %1830 = vsyncadd (%p2080_p6), %s355_s16, 4294963200  ;;  %s374_s30 = sand.u32 1, %s1849_s19   ;;  %s2130_s13 = scalar_lea.vmem [#allocation7], %s2110_s8 }
  0x49   : > { %s1335_s1 = sshll.u32 %s374_s30, 7  ;;  %s375_s6 = scalar_lea.sflag [#allocation9], %s374_s30 }
  0x4a   : > { %s2132_s5 = scalar_lea.vmem [#allocation8], %s1335_s1 }
  0x4b   : > { %1832 = dma.done.wait (%p2091_p1), %s375_s6, 2048  }
  0x4c   : > { %1834 = vsyncadd (%p2091_p1), %s375_s6, 4294965248  ;;  %v477_v0 = vld [vmem:[%s2122_s4 + $0x78] sm:$0xff]  ;;  %v476_v1 = vld [vmem:[%s2122_s4 + $0x70] sm:$0xff]  ;;  %s2300_s29 = scalar_lea.vmem [#allocation11], %s2110_s8  ;;  %s2470_s9 = scalar_lea.vmem [#allocation10], %s2110_s8 }
  0x4d   : > { %478 = vmatpush.xpose.msra.mxu0 %v477_v0  ;;  %1349 = vmatpush.xpose.msra.mxu2 %v477_v0  ;;  %v475_v2 = vld [vmem:[%s2122_s4 + $0x68] sm:$0xff]  ;;  %v474_v3 = vld [vmem:[%s2122_s4 + $0x60] sm:$0xff]  ;;  %v473_v4 = vld [vmem:[%s2122_s4 + $0x58] sm:$0xff]  ;;  %s1340_s7 = sshll.u32 %s1869_s24, 4  ;;  %s1341_s17 = sshll.u32 %s1873_s25, 6 }
  0x4e   : > { %1350 = vmatpush.xpose.msra.mxu3 %v477_v0  ;;  %v472_v5 = vld [vmem:[%s2122_s4 + $0x50] sm:$0xff]  ;;  %v471_v6 = vld [vmem:[%s2122_s4 + $0x48] sm:$0xff]  ;;  %v470_v7 = vld [vmem:[%s2122_s4 + $0x40] sm:$0xff]  ;;  %s2483_s23 = sadd.s32 %s1341_s17, %s1340_s7  ;;  %s2618_s15 = sld [smem:[#allocation27_spill]] }
  0x4f   : > { %v469_v8 = vld [vmem:[%s2122_s4 + $0x38] sm:$0xff]  ;;  %v468_v9 = vld [vmem:[%s2122_s4 + $0x30] sm:$0xff]  ;;  %v467_v10 = vld [vmem:[%s2122_s4 + $0x28] sm:$0xff]  ;;  %s1342_s26 = sshll.u32 %s2483_s23, 3  ;;  %s1099_s24 = sshll.u32 %s2300_s29, 4  ;;  %s1100_s24 = int_to_ptr.vmem [resolvable:$true] %s1099_s24 }
  0x50   : > { %v466_v11 = vld [vmem:[%s2122_s4 + $0x20] sm:$0xff]  ;;  %v465_v12 = vld [vmem:[%s2122_s4 + $0x18] sm:$0xff]  ;;  %v464_v13 = vld [vmem:[%s2122_s4 + $0x10] sm:$0xff]  ;;  %s1062_s25 = scalar_lea.sflag [#allocation12], %s2107_s12 }
  0x51   : > { %479 = vmatpush.xpose.msra.mxu0 %v476_v1  ;;  %1351 = vmatpush.xpose.msra.mxu2 %v476_v1  ;;  %v463_v14 = vld [vmem:[%s2122_s4 + $0x8] sm:$0xff]  ;;  %v430_v15 = vld [vmem:[%s2114_s0] sm:$0xff]  ;;  %v436_v23 = vld [vmem:[%s2114_s0 + $0x30] sm:$0xff] }
  0x52   : > { %1352 = vmatpush.xpose.msra.mxu3 %v476_v1  ;;  %v435_v16 = vld [vmem:[%s2114_s0 + $0x28] sm:$0xff]  ;;  %v462_v17 = vld [vmem:[%s2122_s4] sm:$0xff]  ;;  %v446_v19 = vmul.f32 0.088388346, %v430_v15  ;;  %v452_v26 = vmul.f32 0.088388346, %v436_v23 }
  0x53   : > { %v442_v18 = vld [vmem:[%s2114_s0 + $0x60] sm:$0xff]  ;;  %v451_v20 = vmul.f32 0.088388346, %v435_v16  ;;  %v431_v22 = vld [vmem:[%s2114_s0 + $0x8] sm:$0xff]  ;;  %v432_v28 = vld [vmem:[%s2114_s0 + $0x10] sm:$0xff] }
  0x54   : > { %v458_v21 = vmul.f32 0.088388346, %v442_v18  ;;  %v443_v24 = vld [vmem:[%s2114_s0 + $0x68] sm:$0xff]  ;;  %v447_v25 = vmul.f32 0.088388346, %v431_v22  ;;  %v437_v29 = vld [vmem:[%s2114_s0 + $0x38] sm:$0xff] }
  0x55   : > { %480 = vmatpush.xpose.msra.mxu0 %v475_v2  ;;  %1353 = vmatpush.xpose.msra.mxu2 %v475_v2  ;;  %v459_v27 = vmul.f32 0.088388346, %v443_v24  ;;  %v444_v30 = vld [vmem:[%s2114_s0 + $0x70] sm:$0xff]  ;;  %v448_v31 = vmul.f32 0.088388346, %v432_v28  ;;  %v433_v34 = vld [vmem:[%s2114_s0 + $0x18] sm:$0xff] }
  0x56   : > { %1354 = vmatpush.xpose.msra.mxu3 %v475_v2  ;;  %v453_v32 = vmul.f32 0.088388346, %v437_v29  ;;  %v460_v33 = vmul.f32 0.088388346, %v444_v30  ;;  %v438_v35 = vld [vmem:[%s2114_s0 + $0x40] sm:$0xff]  ;;  %v439_v39 = vld [vmem:[%s2114_s0 + $0x48] sm:$0xff] }
  0x57   : > { %v449_v36 = vmul.f32 0.088388346, %v433_v34  ;;  %v454_v37 = vmul.f32 0.088388346, %v438_v35  ;;  %v434_v38 = vld [vmem:[%s2114_s0 + $0x20] sm:$0xff]  ;;  %v440_v42 = vld [vmem:[%s2114_s0 + $0x50] sm:$0xff] }
  0x58   : > { %v450_v40 = vmul.f32 0.088388346, %v434_v38  ;;  %v455_v41 = vmul.f32 0.088388346, %v439_v39  ;;  %v456_v43 = vmul.f32 0.088388346, %v440_v42 }
  0x59   : > { %481 = vmatpush.xpose.msra.mxu0 %v474_v3  ;;  %1355 = vmatpush.xpose.msra.mxu2 %v474_v3  ;;  %v441_v44 = vld [vmem:[%s2114_s0 + $0x58] sm:$0xff]  ;;  %v549_v51 = vld [vmem:[%s2132_s5 + $0x30] sm:$0xff]  ;;  %v551_v0 = vld [vmem:[%s2132_s5 + $0x40] sm:$0xff] }
  0x5a   : > { %1356 = vmatpush.xpose.msra.mxu3 %v474_v3  ;;  %v457_v45 = vmul.f32 0.088388346, %v441_v44  ;;  %v445_v47 = vld [vmem:[%s2114_s0 + $0x78] sm:$0xff]  ;;  %v545_v52 = vld [vmem:[%s2132_s5 + $0x10] sm:$0xff]  ;;  %vm565_vm0 = vcmp.ne.f32.partialorder %v549_v51, 0.0  ;;  %v547_v1 = vld [vmem:[%s2132_s5 + $0x20] sm:$0xff]  ;;  %s1098_s0 = scalar_lea.hbm %s2618_s15, %s1342_s26 }
  0x5b   : > { %v461_v48 = vmul.f32 0.088388346, %v445_v47  ;;  %vm561_vm1 = vcmp.ne.f32.partialorder %v545_v52, 0.0  ;;  %v550_v57 = vld [vmem:[%s2132_s5 + $0x38] sm:$0xff]  ;;  %vm567_vm4 = vcmp.ne.f32.partialorder %v551_v0, 0.0  ;;  %vm563_vm5 = vcmp.ne.f32.partialorder %v547_v1, 0.0 }
  0x5c   : > { %v546_v58 = vld [vmem:[%s2132_s5 + $0x18] sm:$0xff]  ;;  %vm566_vm2 = vcmp.ne.f32.partialorder %v550_v57, 0.0  ;;  %v557_v15 = vld [vmem:[%s2132_s5 + $0x70] sm:$0xff]  ;;  %s1101_s10 = sshll.u32 %s1098_s0, 4  ;;  %s1102_s10 = int_to_ptr.hbm [resolvable:$true] %s1101_s10 }
  0x5d   : > { %482 = vmatpush.xpose.msra.mxu0 %v473_v4  ;;  %1357 = vmatpush.xpose.msra.mxu2 %v473_v4  ;;  %vm562_vm3 = vcmp.ne.f32.partialorder %v546_v58, 0.0  ;;  %vm573_vm10 = vcmp.ne.f32.partialorder %v557_v15, 0.0  ;;  %v558_v52 = vld [vmem:[%s2132_s5 + $0x78] sm:$0xff]  ;;  %v973_v0 = vld [vmem:[%s2130_s13 + $0x70] sm:$0xff]  ;;  %s1737_s16 = sshra.s32 %s1102_s10, 4  ;;  %s1738_s16 = int_to_ptr.hbm [resolvable:$true] %s1737_s16 }
  0x5e   : > { %1358 = vmatpush.xpose.msra.mxu3 %v473_v4  ;;  %vm574_vm14 = vcmp.ne.f32.partialorder %v558_v52, 0.0  ;;  %v969_v15 = vld [vmem:[%s2130_s13 + $0x50] sm:$0xff]  ;;  %s1739_s4 = scalar_lea.hbm %s1738_s16, 128  ;;  %p1744_p13 = scmp.lt.s32.totalorder %s1738_s16, %s2618_s15 }
  0x5f   : > { %p1740_p2 = scmp.ne.s32.totalorder %s1738_s16, %s1739_s4 }
  0x61   : > { %483 = vmatpush.xpose.msra.mxu0 %v472_v5  ;;  %1359 = vmatpush.xpose.msra.mxu2 %v472_v5  ;;  %p1741_p10 = pnand %p1740_p2, %p2002_p8 }
  0x62   : > { %1360 = vmatpush.xpose.msra.mxu3 %v472_v5 }
  0x63   : > { %p1742_p12 = pneg %p1741_p10 }
  0x65   : > { %484 = vmatpush.xpose.msra.mxu0 %v471_v6  ;;  %1361 = vmatpush.xpose.msra.mxu2 %v471_v6 }
  0x66   : > { %1362 = vmatpush.xpose.msra.mxu3 %v471_v6  ;;  %v552_v6 = vld [vmem:[%s2132_s5 + $0x48] sm:$0xff] }
  0x67   : > { %vm568_vm6 = vcmp.ne.f32.partialorder %v552_v6, 0.0  ;;  %v972_v6 = vld [vmem:[%s2130_s13 + $0x68] sm:$0xff] }
  0x69   : > { %485 = vmatpush.xpose.msra.mxu0 %v470_v7  ;;  %1363 = vmatpush.xpose.msra.mxu2 %v470_v7 }
  0x6a   : > { %1364 = vmatpush.xpose.msra.mxu3 %v470_v7  ;;  %v556_v7 = vld [vmem:[%s2132_s5 + $0x68] sm:$0xff] }
  0x6b   : > { %vm572_vm7 = vcmp.ne.f32.partialorder %v556_v7, 0.0 }
  0x6d   : > { %486 = vmatpush.xpose.msra.mxu0 %v469_v8  ;;  %1365 = vmatpush.xpose.msra.mxu2 %v469_v8 }
  0x6e   : > { %1366 = vmatpush.xpose.msra.mxu3 %v469_v8  ;;  %v548_v8 = vld [vmem:[%s2132_s5 + $0x28] sm:$0xff] }
  0x6f   : > { %vm564_vm8 = vcmp.ne.f32.partialorder %v548_v8, 0.0 }
  0x71   : > { %487 = vmatpush.xpose.msra.mxu0 %v468_v9  ;;  %1367 = vmatpush.xpose.msra.mxu2 %v468_v9 }
  0x72   : > { %1368 = vmatpush.xpose.msra.mxu3 %v468_v9 }
  0x75   : > { %488 = vmatpush.xpose.msra.mxu0 %v467_v10  ;;  %1369 = vmatpush.xpose.msra.mxu2 %v467_v10 }
  0x76   : > { %1370 = vmatpush.xpose.msra.mxu3 %v467_v10 }
  0x79   : > { %489 = vmatpush.xpose.msra.mxu0 %v466_v11  ;;  %1371 = vmatpush.xpose.msra.mxu2 %v466_v11 }
  0x7a   : > { %1372 = vmatpush.xpose.msra.mxu3 %v466_v11 }
  0x7d   : > { %490 = vmatpush.xpose.msra.mxu0 %v465_v12  ;;  %1373 = vmatpush.xpose.msra.mxu2 %v465_v12 }
  0x7e   : > { %1374 = vmatpush.xpose.msra.mxu3 %v465_v12 }
  0x81   : > { %491 = vmatpush.xpose.msra.mxu0 %v464_v13  ;;  %1375 = vmatpush.xpose.msra.mxu2 %v464_v13 }
  0x82   : > { %1376 = vmatpush.xpose.msra.mxu3 %v464_v13 }
  0x85   : > { %492 = vmatpush.xpose.msra.mxu0 %v463_v14  ;;  %1377 = vmatpush.xpose.msra.mxu2 %v463_v14 }
  0x86   : > { %1378 = vmatpush.xpose.msra.mxu3 %v463_v14  ;;  %v553_v14 = vld [vmem:[%s2132_s5 + $0x50] sm:$0xff] }
  0x87   : > { %vm569_vm9 = vcmp.ne.f32.partialorder %v553_v14, 0.0 }
  0x89   : > { %493 = vmatpush.xpose.msra.mxu0 %v462_v17  ;;  %1379 = vmatpush.xpose.msra.mxu2 %v462_v17 }
  0x8a   : > { %1380 = vmatpush.xpose.msra.mxu3 %v462_v17 }
  0x8c   : > { %494 = vmatmul.f32.vlgmr.msra.gmra.mxu0 %v446_v19  ;;  %509 = vmatmul.f32.vlgmr.msra.gmra.mxu2 %v451_v20  ;;  %v543_v20 = vld [vmem:[%s2132_s5] sm:$0xff] }
  0x8d   : > { %530 = vmatmul.f32.vlgmr.msra.gmra.mxu3 %v458_v21  ;;  %v554_v21 = vld [vmem:[%s2132_s5 + $0x58] sm:$0xff]  ;;  %vm559_vm11 = vcmp.ne.f32.partialorder %v543_v20, 0.0 }
  0x8e   : > { %vm570_vm12 = vcmp.ne.f32.partialorder %v554_v21, 0.0 }
  0x94   : > { %497 = vmatmul.f32.gmra.mxu0 %v447_v25  ;;  %512 = vmatmul.f32.gmra.mxu2 %v452_v26  ;;  %v544_v25 = vld [vmem:[%s2132_s5 + $0x8] sm:$0xff] }
  0x95   : > { %533 = vmatmul.f32.gmra.mxu3 %v459_v27  ;;  %vm560_vm13 = vcmp.ne.f32.partialorder %v544_v25, 0.0 }
  0x9c   : > { %500 = vmatmul.f32.gmra.mxu0 %v448_v31  ;;  %515 = vmatmul.f32.gmra.mxu2 %v453_v32 }
  0x9d   : > { %536 = vmatmul.f32.gmra.mxu3 %v460_v33 }
  0xa4   : > { %503 = vmatmul.f32.gmra.mxu0 %v449_v36  ;;  %518 = vmatmul.f32.gmra.mxu2 %v454_v37 }
  0xa5   : > { %539 = vmatmul.f32.gmra.mxu3 %v461_v48 }
  0xac   : > { %506 = vmatmul.f32.gmra.mxu0 %v450_v40  ;;  %521 = vmatmul.f32.gmra.mxu2 %v455_v41 }
  0xb4   : > { %524 = vmatmul.f32.gmra.mxu2 %v456_v43 }
  0xbc   : > { %527 = vmatmul.f32.gmra.mxu2 %v457_v45 }
 0x109   : > { %v2169_v46 = vpop.f32.mrf.mxu0 }
 0x10a   : > { %v2208_v23 = vsel %vm559_vm11, %v2169_v46, -1e+09 }
 0x10f   : > { %v510_v49 = vpop.f32.mrf.mxu2 }
 0x110   : > { %v2184_v62 = vpop.f32.mrf.mxu3  ;;  %v580_v13 = vsel %vm564_vm8, %v510_v49, -1e+09 }
 0x111   : > { %v2172_v50 = vpop.f32.mrf.mxu0 }
 0x112   : > { %v2216_v26 = vsel %vm560_vm13, %v2172_v50, -1e+09 }
 0x117   : > { %v513_v53 = vpop.f32.mrf.mxu2 }
 0x118   : > { %v2176_v54 = vsel %vm565_vm0, %v513_v53, -1e+09  ;;  %v534_v9 = vpop.f32.mrf.mxu3 }
 0x119   : > { %603 = vmax.xlane.f32.xlu2 %v2176_v54  ;;  %v501_v55 = vpop.f32.mrf.mxu0  ;;  %v588_v12 = vsel %vm572_vm7, %v534_v9, -1e+09  ;;  %v971_v9 = vld [vmem:[%s2130_s13 + $0x60] sm:$0xff] }
 0x11a   : > { %v2179_v56 = vsel %vm561_vm1, %v501_v55, -1e+09 }
 0x11b   : > { %595 = vmax.xlane.f32.xlu0 %v2179_v56 }
 0x11f   : > { %v516_v59 = vpop.f32.mrf.mxu2 }
 0x120   : > { %v582_v60 = vsel %vm566_vm2, %v516_v59, -1e+09  ;;  %v537_v16 = vpop.f32.mrf.mxu3 }
 0x121   : > { %605 = vmax.xlane.f32.xlu2 %v582_v60  ;;  %v504_v61 = vpop.f32.mrf.mxu0  ;;  %v2201_v19 = vsel %vm573_vm10, %v537_v16, -1e+09 }
 0x122   : > { %v578_v63 = vsel %vm562_vm3, %v504_v61, -1e+09 }
 0x123   : > { %597 = vmax.xlane.f32.xlu0 %v578_v63 }
 0x127   : > { %v519_v2 = vpop.f32.mrf.mxu2 }
 0x128   : > { %v2188_v3 = vsel %vm567_vm4, %v519_v2, -1e+09 }
 0x129   : > { %v507_v4 = vpop.f32.mrf.mxu0 }
 0x12a   : > { %v579_v5 = vsel %vm563_vm5, %v507_v4, -1e+09  ;;  %v555_v4 = vld [vmem:[%s2132_s5 + $0x60] sm:$0xff] }
 0x12b   : > { %607 = vmax.xlane.f32.xlu0 %v2188_v3  ;;  %599 = vmax.xlane.f32.xlu1 %v579_v5  ;;  %vm571_vm15 = vcmp.ne.f32.partialorder %v555_v4, 0.0 }
 0x12c   : > { %v2256_v14 = vsel %vm571_vm15, %v2184_v62, -1e+09 }
 0x12f   : > { %v522_v10 = vpop.f32.mrf.mxu2 }
 0x130   : > { %v2194_v11 = vsel %vm568_vm6, %v522_v10, -1e+09 }
 0x131   : > { %609 = vmax.xlane.f32.xlu2 %v2194_v11 }
 0x133   : > { %617 = vmax.xlane.f32.xlu0 %v588_v12  ;;  %601 = vmax.xlane.f32.xlu1 %v580_v13 }
 0x137   : > { %v525_v17 = vpop.f32.mrf.mxu2 }
 0x138   : > { %v2199_v18 = vsel %vm569_vm9, %v525_v17, -1e+09 }
 0x139   : > { %611 = vmax.xlane.f32.xlu2 %v2199_v18 }
 0x13b   : > { %619 = vmax.xlane.f32.xlu0 %v2201_v19 }
 0x13f   : > { %v528_v22 = vpop.f32.mrf.mxu2 }
 0x140   : > { %v2210_v24 = vsel %vm570_vm12, %v528_v22, -1e+09 }
 0x141   : > { %591 = vmax.xlane.f32.xlu2 %v2208_v23 }
 0x143   : > { %613 = vmax.xlane.f32.xlu0 %v2210_v24 }
 0x14b   : > { %593 = vmax.xlane.f32.xlu0 %v2216_v26 }
 0x18c   : > { %v604_v27 = vpop.xlane.xlu2 %603 }
 0x18d   : > { %v629_v53 = vsub.f32 %v2176_v54, %v604_v27  ;;  %v974_v54 = vld [vmem:[%s2130_s13 + $0x78] sm:$0xff] }
 0x18e   : > { %v596_v28 = vpop.xlane.xlu0 %595  ;;  %1381 = vmatpush.msra.mxu1 %v974_v54  ;;  %1382 = vmatpush.msrb.mxu3 %v974_v54 }
 0x18f   : > { %v625_v29 = vsub.f32 %v2179_v56, %v596_v28  ;;  %v540_v56 = vpop.f32.mrf.mxu3  ;;  %v651_v58 = vmul.f32 1.442695, %v629_v53  ;;  %975 = vmatpush.msrb.mxu0 %v974_v54 }
 0x190   : > { %v2234_v59 = vsel %vm574_vm14, %v540_v56, -1e+09  ;;  %1383 = vmatpush.msra.mxu1 %v973_v0  ;;  %1384 = vmatpush.msrb.mxu3 %v973_v0 }
 0x191   : > { %v643_v30 = vmul.f32 1.442695, %v625_v29  ;;  %976 = vmatpush.msrb.mxu0 %v973_v0 }
 0x192   : > { %1385 = vmatpush.msra.mxu1 %v972_v6  ;;  %1386 = vmatpush.msrb.mxu3 %v972_v6 }
 0x193   : > { %1539 = vpow2.f32 %v643_v30  ;;  %977 = vmatpush.msrb.mxu0 %v972_v6 }
 0x194   : > { %v606_v31 = vpop.xlane.xlu2 %605  ;;  %1387 = vmatpush.msra.mxu1 %v971_v9  ;;  %1388 = vmatpush.msrb.mxu3 %v971_v9 }
 0x195   : > { %v630_v32 = vsub.f32 %v582_v60, %v606_v31  ;;  %978 = vmatpush.msrb.mxu0 %v971_v9  ;;  %v967_v31 = vld [vmem:[%s2130_s13 + $0x40] sm:$0xff] }
 0x196   : > { %v598_v33 = vpop.xlane.xlu0 %597 }
 0x197   : > { %v653_v34 = vmul.f32 1.442695, %v630_v32  ;;  %v626_v35 = vsub.f32 %v578_v63, %v598_v33  ;;  %v966_v32 = vld [vmem:[%s2130_s13 + $0x38] sm:$0xff]  ;;  %v965_v33 = vld [vmem:[%s2130_s13 + $0x30] sm:$0xff] }
 0x199   : > { %v2220_v36 = vpop.eup %1539  ;;  %1541 = vpow2.f32 %v653_v34  ;;  %v645_v37 = vmul.f32 1.442695, %v626_v35  ;;  %v964_v34 = vld [vmem:[%s2130_s13 + $0x28] sm:$0xff]  ;;  %v963_v35 = vld [vmem:[%s2130_s13 + $0x20] sm:$0xff] }
 0x19a   : > { %675 = vadd.xlane.f32.xlu1 %v2220_v36 }
 0x19b   : > { %1543 = vpow2.f32 %v645_v37  ;;  %v962_v37 = vld [vmem:[%s2130_s13 + $0x18] sm:$0xff] }
 0x19e   : > { %v608_v38 = vpop.xlane.xlu0 %607  ;;  %v600_v39 = vpop.xlane.xlu1 %599 }
 0x19f   : > { %v2223_v40 = vpop.eup %1541  ;;  %v627_v41 = vsub.f32 %v579_v5, %v600_v39  ;;  %v631_v63 = vsub.f32 %v2188_v3, %v608_v38  ;;  %v961_v38 = vld [vmem:[%s2130_s13 + $0x10] sm:$0xff]  ;;  %v960_v39 = vld [vmem:[%s2130_s13 + $0x8] sm:$0xff] }
 0x1a0   : > { %685 = vadd.xlane.f32.xlu0 %v2223_v40 }
 0x1a1   : > { %v2226_v42 = vpop.eup %1543  ;;  %v647_v43 = vmul.f32 1.442695, %v627_v41  ;;  %v655_v7 = vmul.f32 1.442695, %v631_v63  ;;  %v959_v41 = vld [vmem:[%s2130_s13] sm:$0xff] }
 0x1a2   : > { %677 = vadd.xlane.f32.xlu1 %v2226_v42 }
 0x1a3   : > { %1545 = vpow2.f32 %v647_v43 }
 0x1a4   : > { %v610_v44 = vpop.xlane.xlu2 %609 }
 0x1a5   : > { %v632_v1 = vsub.f32 %v2194_v11, %v610_v44  ;;  %v970_v11 = vld [vmem:[%s2130_s13 + $0x58] sm:$0xff] }
 0x1a6   : > { %v618_v45 = vpop.xlane.xlu0 %617  ;;  %v602_v46 = vpop.xlane.xlu1 %601  ;;  %1389 = vmatpush.msra.mxu1 %v970_v11  ;;  %1390 = vmatpush.msrb.mxu3 %v970_v11 }
 0x1a7   : > { %v636_v47 = vsub.f32 %v588_v12, %v618_v45  ;;  %v628_v48 = vsub.f32 %v580_v13, %v602_v46  ;;  %v657_v10 = vmul.f32 1.442695, %v632_v1  ;;  %979 = vmatpush.msrb.mxu0 %v970_v11 }
 0x1a8   : > { %1391 = vmatpush.msra.mxu1 %v969_v15  ;;  %1392 = vmatpush.msrb.mxu3 %v969_v15 }
 0x1a9   : > { %v665_v49 = vmul.f32 1.442695, %v636_v47  ;;  %v649_v50 = vmul.f32 1.442695, %v628_v48  ;;  %v2229_v51 = vpop.eup %1545  ;;  %980 = vmatpush.msrb.mxu0 %v969_v15 }
 0x1aa   : > { %679 = vadd.xlane.f32.xlu1 %v2229_v51 }
 0x1ab   : > { %1547 = vpow2.f32 %v665_v49 }
 0x1ac   : > { %1549 = vpow2.f32 %v649_v50  ;;  %v612_v55 = vpop.xlane.xlu2 %611 }
 0x1ad   : > { %1551 = vpow2.f32 %v651_v58  ;;  %v633_v13 = vsub.f32 %v2199_v18, %v612_v55 }
 0x1ae   : > { %v620_v57 = vpop.xlane.xlu0 %619 }
 0x1af   : > { %v637_v16 = vsub.f32 %v2201_v19, %v620_v57  ;;  %v659_v17 = vmul.f32 1.442695, %v633_v13 }
 0x1b1   : > { %v2236_v60 = vpop.eup %1547  ;;  %v667_v21 = vmul.f32 1.442695, %v637_v16 }
 0x1b2   : > { %v2238_v61 = vpop.eup %1549  ;;  %697 = vadd.xlane.f32.xlu0 %v2236_v60  ;;  %621 = vmax.xlane.f32.xlu1 %v2234_v59 }
 0x1b3   : > { %681 = vadd.xlane.f32.xlu2 %v2238_v61  ;;  %v2252_v12 = vpop.eup %1551 }
 0x1b4   : > { %v592_v2 = vpop.xlane.xlu2 %591 }
 0x1b5   : > { %v623_v5 = vsub.f32 %v2208_v23, %v592_v2 }
 0x1b6   : > { %v614_v3 = vpop.xlane.xlu0 %613 }
 0x1b7   : > { %v639_v8 = vmul.f32 1.442695, %v623_v5  ;;  %v634_v25 = vsub.f32 %v2210_v24, %v614_v3  ;;  %v968_v24 = vld [vmem:[%s2130_s13 + $0x48] sm:$0xff]  ;;  %s1743_s13 = scalar_lea.hbm %s2618_s15, 1024 }
 0x1b8   : > { %1393 = vmatpush.msra.mxu1 %v968_v24  ;;  %1394 = vmatpush.msrb.mxu3 %v968_v24  ;;  %p1745_p3 = scmp.lt.s32.totalorder %s1743_s13, %s1739_s4 }
 0x1b9   : > { %1553 = vpow2.f32 %v639_v8  ;;  %v661_v27 = vmul.f32 1.442695, %v634_v25  ;;  %981 = vmatpush.msrb.mxu0 %v968_v24 }
 0x1ba   : > { %1555 = vpow2.f32 %v655_v7  ;;  %615 = vmax.xlane.f32.xlu1 %v2256_v14  ;;  %1395 = vmatpush.msra.mxu1 %v967_v31  ;;  %p1746_p4 = por %p1745_p3, %p1744_p13 }
 0x1bb   : > { %683 = vadd.xlane.f32.xlu2 %v2252_v12  ;;  %1557 = vpow2.f32 %v657_v10  ;;  %1396 = vmatpush.msrb.mxu3 %v967_v31 }
 0x1bc   : > { %1559 = vpow2.f32 %v659_v17  ;;  %982 = vmatpush.msrb.mxu0 %v967_v31  ;;  %1397 = vmatpush.msra.mxu1 %v966_v32  ;;  %p1747_p6 = pnand %p1746_p4, %p1742_p12 }
 0x1bd   : > { %1398 = vmatpush.msrb.mxu3 %v966_v32 }
 0x1be   : > { %v594_v20 = vpop.xlane.xlu0 %593  ;;  %983 = vmatpush.msrb.mxu0 %v966_v32  ;;  %1399 = vmatpush.msra.mxu1 %v965_v33 }
 0x1bf   : > { %v2262_v62 = vpop.eup %1553  ;;  %v624_v18 = vsub.f32 %v2216_v26, %v594_v20  ;;  %1400 = vmatpush.msrb.mxu3 %v965_v33 }
 0x1c0   : > { %671 = vadd.xlane.f32.xlu0 %v2262_v62  ;;  %v2266_v22 = vpop.eup %1555  ;;  %984 = vmatpush.msrb.mxu0 %v965_v33 }
 0x1c1   : > { %v641_v23 = vmul.f32 1.442695, %v624_v18  ;;  %v2268_v19 = vpop.eup %1557  ;;  %1401 = vmatpush.msra.mxu1 %v964_v34  ;;  %1402 = vmatpush.msrb.mxu3 %v964_v34 }
 0x1c2   : > { %687 = vadd.xlane.f32.xlu1 %v2266_v22  ;;  %v2273_v26 = vpop.eup %1559  ;;  %985 = vmatpush.msrb.mxu0 %v964_v34 }
 0x1c3   : > { %1561 = vpow2.f32 %v641_v23  ;;  %689 = vadd.xlane.f32.xlu2 %v2268_v19  ;;  %1403 = vmatpush.msra.mxu1 %v963_v35 }
 0x1c4   : > { %1563 = vpow2.f32 %v667_v21  ;;  %1404 = vmatpush.msrb.mxu3 %v963_v35  ;;  %986 = vmatpush.msrb.mxu0 %v963_v35 }
 0x1c5   : > { %1565 = vpow2.f32 %v661_v27  ;;  %1405 = vmatpush.msra.mxu1 %v962_v37 }
 0x1c6   : > { %1406 = vmatpush.msrb.mxu3 %v962_v37  ;;  %987 = vmatpush.msrb.mxu0 %v962_v37 }
 0x1c7   : > { %1407 = vmatpush.msra.mxu1 %v961_v38 }
 0x1c8   : > { %1408 = vmatpush.msrb.mxu3 %v961_v38  ;;  %988 = vmatpush.msrb.mxu0 %v961_v38 }
 0x1c9   : > { %v2275_v28 = vpop.eup %1561  ;;  %1409 = vmatpush.msra.mxu1 %v960_v39 }
 0x1ca   : > { %v2277_v29 = vpop.eup %1563  ;;  %673 = vadd.xlane.f32.xlu0 %v2275_v28  ;;  %691 = vadd.xlane.f32.xlu1 %v2273_v26 }
 0x1cb   : > { %699 = vadd.xlane.f32.xlu2 %v2277_v29  ;;  %v2282_v30 = vpop.eup %1565  ;;  %1410 = vmatpush.msrb.mxu3 %v960_v39 }
 0x1cc   : > { %989 = vmatpush.msrb.mxu0 %v960_v39  ;;  %1411 = vmatpush.msra.mxu1 %v959_v41 }
 0x1cd   : > { %1412 = vmatpush.msrb.mxu3 %v959_v41 }
 0x1ce   : > { %990 = vmatpush.msrb.mxu0 %v959_v41 }
 0x1d2   : > { %693 = vadd.xlane.f32.xlu1 %v2282_v30 }
 0x20d   : > { %v676_v43 = vpop.xlane.xlu1 %675 }
 0x20e   : > { %1567 = vrcp.f32 %v676_v43  ;;  %v742_v49 = vand.u32 2147483648, %v676_v43  ;;  %v740_v52 = vand.u32 2147483647, %v676_v43  ;;  %vm736_vm1 = vweird.f32 %v676_v43 }
 0x210   : > { %v743_v58 = vor.u32 1.1754944e-38, %v742_v49  ;;  %vm741_vm3 = vcmp.eq.f32.partialorder %v740_v52, 8.507059e+37 }
 0x213   : > { %v686_v44 = vpop.xlane.xlu0 %685 }
 0x214   : > { %v1568_v45 = vpop.eup %1567  ;;  %1569 = vrcp.f32 %v686_v44  ;;  %v810_v4 = vand.u32 2147483647, %v686_v44  ;;  %v812_v5 = vand.u32 2147483648, %v686_v44  ;;  %vm806_vm5 = vweird.f32 %v686_v44 }
 0x215   : > { %v732_v46 = vmul.f32 %v1568_v45, %v676_v43  ;;  %v678_v47 = vpop.xlane.xlu1 %677  ;;  %vm737_vm0 = vweird.f32 %v1568_v45 }
 0x216   : > { %1571 = vrcp.f32 %v678_v47  ;;  %vm738_vm2 = vmor %vm736_vm1, %vm737_vm0  ;;  %v756_v9 = vand.u32 2147483648, %v678_v47  ;;  %v754_v11 = vand.u32 2147483647, %v678_v47  ;;  %v813_v13 = vor.u32 1.1754944e-38, %v812_v5 }
 0x217   : > { %v733_v48 = vsub.f32 1.0, %v732_v46  ;;  %vm750_vm8 = vweird.f32 %v678_v47  ;;  %vm811_vm9 = vcmp.eq.f32.partialorder %v810_v4, 8.507059e+37 }
 0x218   : > { %v757_v21 = vor.u32 1.1754944e-38, %v756_v9  ;;  %vm755_vm11 = vcmp.eq.f32.partialorder %v754_v11, 8.507059e+37 }
 0x219   : > { %v734_v50 = vmul.f32 %v1568_v45, %v733_v48 }
 0x21a   : > { %v1570_v53 = vpop.eup %1569 }
 0x21b   : > { %v802_v55 = vmul.f32 %v1570_v53, %v686_v44  ;;  %v735_v56 = vadd.f32 %v1568_v45, %v734_v50  ;;  %vm807_vm4 = vweird.f32 %v1570_v53 }
 0x21c   : > { %v1572_v57 = vpop.eup %1571  ;;  %vm808_vm7 = vmor %vm806_vm5, %vm807_vm4 }
 0x21d   : > { %v803_v63 = vsub.f32 1.0, %v802_v55  ;;  %v746_v54 = vmul.f32 %v1572_v57, %v678_v47  ;;  %v739_v0 = vsel %vm738_vm2, %v1568_v45, %v735_v56  ;;  %v2295_v1 = vpop.xlane.xlu1 %679  ;;  %vm751_vm6 = vweird.f32 %v1572_v57 }
 0x21e   : > { %v744_v2 = vsel %vm741_vm3, %v743_v58, %v739_v0  ;;  %1573 = vrcp.f32 %v2295_v1  ;;  %vm752_vm10 = vmor %vm750_vm8, %vm751_vm6  ;;  %v768_v38 = vand.u32 2147483647, %v2295_v1  ;;  %vm764_vm13 = vweird.f32 %v2295_v1 }
 0x21f   : > { %v804_v6 = vmul.f32 %v1570_v53, %v803_v63  ;;  %v747_v3 = vsub.f32 1.0, %v746_v54  ;;  %v929_v7 = vmul.f32 %v2220_v36, %v744_v2 }
 0x220   : > { %vm769_vm15 = vcmp.eq.f32.partialorder %v768_v38, 8.507059e+37 }
 0x221   : > { %v748_v8 = vmul.f32 %v1572_v57, %v747_v3  ;;  %945 = vst [vmem:[%s2300_s29 + $0x10] sm:$0xff] %v929_v7  ;;  %997 = vmatmul.f32.vlgmr.msra.gmra.mxu1 %v929_v7  ;;  %v805_v10 = vadd.f32 %v1570_v53, %v804_v6 }
 0x223   : > { %v749_v15 = vadd.f32 %v1572_v57, %v748_v8  ;;  %v809_v16 = vsel %vm808_vm7, %v1570_v53, %v805_v10 }
 0x224   : > { %v814_v36 = vsel %vm811_vm9, %v813_v13, %v809_v16  ;;  %v1574_v17 = vpop.eup %1573 }
 0x225   : > { %v2304_v20 = vpop.xlane.xlu0 %697  ;;  %v753_v18 = vsel %vm752_vm10, %v1572_v57, %v749_v15  ;;  %v2307_v23 = vmul.f32 %v2223_v40, %v814_v36  ;;  %v760_v25 = vmul.f32 %v1574_v17, %v2295_v1  ;;  %v622_v24 = vpop.xlane.xlu1 %621  ;;  %v770_v40 = vand.u32 2147483648, %v2295_v1 }
 0x226   : > { %1575 = vrcp.f32 %v2304_v20  ;;  %v682_v27 = vpop.xlane.xlu2 %681  ;;  %v638_v31 = vsub.f32 %v2234_v59, %v622_v24  ;;  %v758_v32 = vsel %vm755_vm11, %v757_v21, %v753_v18  ;;  %vm765_vm12 = vweird.f32 %v1574_v17 }
 0x227   : > { %1577 = vrcp.f32 %v682_v27  ;;  %950 = vst [vmem:[%s2300_s29 + $0x38] sm:$0xff] %v2307_v23  ;;  %v761_v33 = vsub.f32 1.0, %v760_v25  ;;  %v930_v34 = vmul.f32 %v2226_v42, %v758_v32  ;;  %vm766_vm14 = vmor %vm764_vm13, %vm765_vm12  ;;  %v771_v44 = vor.u32 1.1754944e-38, %v770_v40 }
 0x228   : > { %v669_v35 = vmul.f32 1.442695, %v638_v31  ;;  %v896_v42 = vand.u32 2147483648, %v2304_v20  ;;  %v782_v56 = vand.u32 2147483647, %v682_v27  ;;  %v784_v57 = vand.u32 2147483648, %v682_v27 }
 0x229   : > { %v762_v37 = vmul.f32 %v1574_v17, %v761_v33  ;;  %946 = vst [vmem:[%s2300_s29 + $0x18] sm:$0xff] %v930_v34  ;;  %1000 = vmatmul.f32.gmra.mxu1 %v930_v34  ;;  %v894_v0 = vand.u32 2147483647, %v2304_v20  ;;  %vm890_vm2 = vweird.f32 %v2304_v20  ;;  %vm778_vm3 = vweird.f32 %v682_v27 }
 0x22a   : > { %1579 = vpow2.f32 %v669_v35  ;;  %vm2335_vm4 = vcmp.eq.f32.partialorder %v782_v56, 8.507059e+37  ;;  %v785_v3 = vor.u32 1.1754944e-38, %v784_v57 }
 0x22b   : > { %v763_v41 = vadd.f32 %v1574_v17, %v762_v37  ;;  %vm895_vm7 = vcmp.eq.f32.partialorder %v894_v0, 8.507059e+37 }
 0x22c   : > { %v1576_v39 = vpop.eup %1575 }
 0x22d   : > { %v1578_v59 = vpop.eup %1577  ;;  %v886_v43 = vmul.f32 %v1576_v39, %v2304_v20  ;;  %v616_v47 = vpop.xlane.xlu1 %615  ;;  %v767_v48 = vsel %vm766_vm14, %v1574_v17, %v763_v41  ;;  %vm891_vm0 = vweird.f32 %v1576_v39 }
 0x22e   : > { %v774_v45 = vmul.f32 %v1578_v59, %v682_v27  ;;  %v2321_v46 = vpop.xlane.xlu2 %683  ;;  %v635_v50 = vsub.f32 %v2256_v14, %v616_v47  ;;  %v772_v52 = vsel %vm769_vm15, %v771_v44, %v767_v48  ;;  %vm779_vm1 = vweird.f32 %v1578_v59  ;;  %vm892_vm5 = vmor %vm890_vm2, %vm891_vm0 }
 0x22f   : > { %v887_v49 = vsub.f32 1.0, %v886_v43  ;;  %1581 = vrcp.f32 %v2321_v46  ;;  %v931_v55 = vmul.f32 %v2229_v51, %v772_v52  ;;  %v897_v14 = vor.u32 1.1754944e-38, %v896_v42  ;;  %vm780_vm6 = vmor %vm778_vm3, %vm779_vm1 }
 0x230   : > { %v775_v53 = vsub.f32 1.0, %v774_v45  ;;  %v2326_v58 = vpop.eup %1579  ;;  %v663_v54 = vmul.f32 1.442695, %v635_v50  ;;  %v796_v8 = vand.u32 2147483647, %v2321_v46  ;;  %v798_v16 = vand.u32 2147483648, %v2321_v46 }
 0x231   : > { %v888_v63 = vmul.f32 %v1576_v39, %v887_v49  ;;  %947 = vst [vmem:[%s2300_s29 + $0x20] sm:$0xff] %v931_v55  ;;  %1003 = vmatmul.f32.gmra.mxu1 %v931_v55  ;;  %701 = vadd.xlane.f32.xlu2 %v2326_v58  ;;  %vm792_vm8 = vweird.f32 %v2321_v46 }
 0x232   : > { %v776_v1 = vmul.f32 %v1578_v59, %v775_v53  ;;  %1583 = vpow2.f32 %v663_v54  ;;  %vm2362_vm10 = vcmp.eq.f32.partialorder %v796_v8, 8.507059e+37 }
 0x233   : > { %v2332_v51 = vpop.xlane.xlu0 %671  ;;  %v889_v2 = vadd.f32 %v1576_v39, %v888_v63 }
 0x234   : > { %1585 = vrcp.f32 %v2332_v51  ;;  %v777_v4 = vadd.f32 %v1578_v59, %v776_v1  ;;  %v714_v36 = vand.u32 2147483648, %v2332_v51  ;;  %v712_v25 = vand.u32 2147483647, %v2332_v51 }
 0x235   : > { %v1582_v6 = vpop.eup %1581  ;;  %v893_v7 = vsel %vm892_vm5, %v1576_v39, %v889_v2  ;;  %v2344_v11 = vpop.xlane.xlu1 %687  ;;  %vm708_vm11 = vweird.f32 %v2332_v51 }
 0x236   : > { %v788_v9 = vmul.f32 %v1582_v6, %v2321_v46  ;;  %v2342_v10 = vpop.xlane.xlu2 %689  ;;  %v781_v13 = vsel %vm780_vm6, %v1578_v59, %v777_v4  ;;  %v898_v15 = vsel %vm895_vm7, %v897_v14, %v893_v7  ;;  %vm793_vm9 = vweird.f32 %v1582_v6 }
 0x237   : > { %1587 = vrcp.f32 %v2342_v10  ;;  %v786_v17 = vsel %vm2335_vm4, %v785_v3, %v781_v13  ;;  %v940_v20 = vmul.f32 %v2236_v60, %v898_v15  ;;  %v715_v33 = vor.u32 1.1754944e-38, %v714_v36  ;;  %vm794_vm14 = vmor %vm792_vm8, %vm793_vm9 }
 0x238   : > { %v789_v18 = vsub.f32 1.0, %v788_v9  ;;  %1589 = vrcp.f32 %v2344_v11  ;;  %v932_v21 = vmul.f32 %v2238_v61, %v786_v17  ;;  %v2355_v27 = vpop.eup %1583  ;;  %v799_v61 = vor.u32 1.1754944e-38, %v798_v16 }
 0x239   : > { %956 = vst [vmem:[%s2300_s29 + $0x68] sm:$0xff] %v940_v20  ;;  %1030 = vmatmul.f32.vlgmr.msrb.gmra.mxu3 %v940_v20  ;;  %695 = vadd.xlane.f32.xlu1 %v2355_v27  ;;  %vm2367_vm12 = vcmp.eq.f32.partialorder %v712_v25, 8.507059e+37  ;;  %vm820_vm13 = vweird.f32 %v2344_v11  ;;  %v824_v39 = vand.u32 2147483647, %v2344_v11  ;;  %v826_v41 = vand.u32 2147483648, %v2344_v11 }
 0x23a   : > { %v1586_v24 = vpop.eup %1585  ;;  %v790_v31 = vmul.f32 %v1582_v6, %v789_v18  ;;  %948 = vst [vmem:[%s2300_s29 + $0x28] sm:$0xff] %v932_v21  ;;  %1006 = vmatmul.f32.gmra.mxu1 %v932_v21  ;;  %v838_v59 = vand.u32 2147483647, %v2342_v10  ;;  %v840_v47 = vand.u32 2147483648, %v2342_v10  ;;  %vm834_vm0 = vweird.f32 %v2342_v10 }
 0x23b   : > { %v704_v60 = vmul.f32 %v1586_v24, %v2332_v51  ;;  %vm709_vm15 = vweird.f32 %v1586_v24  ;;  %vm2397_vm1 = vcmp.eq.f32.partialorder %v824_v39, 8.507059e+37  ;;  %v827_v54 = vor.u32 1.1754944e-38, %v826_v41 }
 0x23c   : > { %v791_v34 = vadd.f32 %v1582_v6, %v790_v31  ;;  %vm710_vm2 = vmor %vm708_vm11, %vm709_vm15  ;;  %vm2405_vm3 = vcmp.eq.f32.partialorder %v838_v59, 8.507059e+37  ;;  %v841_v1 = vor.u32 1.1754944e-38, %v840_v47 }
 0x23d   : > { %v2371_v40 = vpop.eup %1587  ;;  %v705_v37 = vsub.f32 1.0, %v704_v60  ;;  %v2373_v38 = vpop.xlane.xlu0 %673 }
 0x23e   : > { %v1590_v43 = vpop.eup %1589  ;;  %v830_v44 = vmul.f32 %v2371_v40, %v2342_v10  ;;  %1591 = vrcp.f32 %v2373_v38  ;;  %v2382_v42 = vpop.xlane.xlu2 %699  ;;  %v795_v50 = vsel %vm794_vm14, %v1582_v6, %v791_v34  ;;  %vm722_vm4 = vweird.f32 %v2373_v38 }
 0x23f   : > { %v2384_v45 = vpop.xlane.xlu1 %691  ;;  %v706_v48 = vmul.f32 %v1586_v24, %v705_v37  ;;  %v816_v49 = vmul.f32 %v1590_v43, %v2344_v11  ;;  %1593 = vrcp.f32 %v2382_v42  ;;  %v800_v53 = vsel %vm2362_vm10, %v799_v61, %v795_v50 }
 0x240   : > { %v831_v52 = vsub.f32 1.0, %v830_v44  ;;  %1595 = vrcp.f32 %v2384_v45  ;;  %v933_v55 = vmul.f32 %v2252_v12, %v800_v53  ;;  %vm821_vm5 = vweird.f32 %v1590_v43 }
 0x241   : > { %v817_v46 = vsub.f32 1.0, %v816_v49  ;;  %v707_v56 = vadd.f32 %v1586_v24, %v706_v48  ;;  %v728_v4 = vand.u32 2147483648, %v2373_v38  ;;  %vm835_vm6 = vweird.f32 %v2371_v40  ;;  %vm822_vm8 = vmor %vm820_vm13, %vm821_vm5 }
 0x242   : > { %v832_v63 = vmul.f32 %v2371_v40, %v831_v52  ;;  %949 = vst [vmem:[%s2300_s29 + $0x30] sm:$0xff] %v933_v55  ;;  %1009 = vmatmul.f32.gmra.mxu1 %v933_v55  ;;  %v726_v8 = vand.u32 2147483647, %v2373_v38  ;;  %vm2421_vm7 = vmor %vm834_vm0, %vm835_vm6  ;;  %v910_v17 = vand.u32 2147483648, %v2382_v42  ;;  %v854_v35 = vand.u32 2147483648, %v2384_v45 }
 0x243   : > { %v818_v14 = vmul.f32 %v1590_v43, %v817_v46  ;;  %v711_v12 = vsel %vm710_vm2, %v1586_v24, %v707_v56  ;;  %v852_v39 = vand.u32 2147483647, %v2384_v45  ;;  %vm904_vm14 = vweird.f32 %v2382_v42 }
 0x244   : > { %v1592_v2 = vpop.eup %1591  ;;  %v716_v51 = vsel %vm2367_vm12, %v715_v33, %v711_v12  ;;  %v833_v5 = vadd.f32 %v2371_v40, %v832_v63  ;;  %v729_v33 = vor.u32 1.1754944e-38, %v728_v4  ;;  %vm727_vm13 = vcmp.eq.f32.partialorder %v726_v8, 8.507059e+37 }
 0x245   : > { %v1594_v6 = vpop.eup %1593  ;;  %v718_v3 = vmul.f32 %v1592_v2, %v2373_v38  ;;  %v927_v7 = vmul.f32 %v2262_v62, %v716_v51  ;;  %v819_v9 = vadd.f32 %v1590_v43, %v818_v14  ;;  %v908_v62 = vand.u32 2147483647, %v2382_v42 }
 0x246   : > { %v1596_v15 = vpop.eup %1595  ;;  %v900_v16 = vmul.f32 %v1594_v6, %v2382_v42  ;;  %v837_v10 = vsel %vm2421_vm7, %v2371_v40, %v833_v5  ;;  %vm723_vm9 = vweird.f32 %v1592_v2  ;;  %vm905_vm10 = vweird.f32 %v1594_v6 }
 0x247   : > { %v2426_v36 = vpop.xlane.xlu1 %693  ;;  %v719_v20 = vsub.f32 1.0, %v718_v3  ;;  %v844_v18 = vmul.f32 %v1596_v15, %v2384_v45  ;;  %943 = vst [vmem:[%s2300_s29] sm:$0xff] %v927_v7  ;;  %991 = vmatmul.f32.vlgmr.msrb.gmra.mxu0 %v927_v7  ;;  %v823_v21 = vsel %vm822_vm8, %v1590_v43, %v819_v9  ;;  %v842_v24 = vsel %vm2405_vm3, %v841_v1, %v837_v10  ;;  %vm724_vm12 = vmor %vm722_vm4, %vm723_vm9 }
 0x248   : > { %1597 = vrcp.f32 %v2426_v36  ;;  %v901_v11 = vsub.f32 1.0, %v900_v16  ;;  %v828_v25 = vsel %vm2397_vm1, %v827_v54, %v823_v21  ;;  %v936_v61 = vmul.f32 %v2268_v19, %v842_v24  ;;  %vm906_vm0 = vmor %vm904_vm14, %vm905_vm10 }
 0x249   : > { %v720_v31 = vmul.f32 %v1592_v2, %v719_v20  ;;  %v845_v60 = vsub.f32 1.0, %v844_v18  ;;  %v935_v32 = vmul.f32 %v2266_v22, %v828_v25  ;;  %vm849_vm11 = vweird.f32 %v1596_v15 }
 0x24a   : > { %v902_v34 = vmul.f32 %v1594_v6, %v901_v11  ;;  %1012 = vmatmul.f32.gmra.mxu1 %v2307_v23  ;;  %vm909_vm15 = vcmp.eq.f32.partialorder %v908_v62, 8.507059e+37  ;;  %952 = vst [vmem:[%s2300_s29 + $0x48] sm:$0xff] %v936_v61  ;;  %v911_v23 = vor.u32 1.1754944e-38, %v910_v17  ;;  %vm848_vm1 = vweird.f32 %v2384_v45 }
 0x24b   : > { %v846_v40 = vmul.f32 %v1596_v15, %v845_v60  ;;  %v721_v37 = vadd.f32 %v1592_v2, %v720_v31  ;;  %951 = vst [vmem:[%s2300_s29 + $0x40] sm:$0xff] %v935_v32  ;;  %vm850_vm2 = vmor %vm848_vm1, %vm849_vm11  ;;  %v855_v47 = vor.u32 1.1754944e-38, %v854_v35  ;;  %vm853_vm3 = vcmp.eq.f32.partialorder %v852_v39, 8.507059e+37 }
 0x24c   : > { %v903_v22 = vadd.f32 %v1594_v6, %v902_v34  ;;  %v868_v46 = vand.u32 2147483648, %v2426_v36  ;;  %vm862_vm5 = vweird.f32 %v2426_v36 }
 0x24d   : > { %v725_v41 = vsel %vm724_vm12, %v1592_v2, %v721_v37  ;;  %v847_v59 = vadd.f32 %v1596_v15, %v846_v40 }
 0x24e   : > { %v1598_v19 = vpop.eup %1597  ;;  %v730_v44 = vsel %vm727_vm13, %v729_v33, %v725_v41  ;;  %v907_v38 = vsel %vm906_vm0, %v1594_v6, %v903_v22 }
 0x24f   : > { %v858_v43 = vmul.f32 %v1598_v19, %v2426_v36  ;;  %v928_v42 = vmul.f32 %v2275_v28, %v730_v44  ;;  %v912_v48 = vsel %vm909_vm15, %v911_v23, %v907_v38  ;;  %v851_v49 = vsel %vm850_vm2, %v1596_v15, %v847_v59 }
 0x250   : > { %v941_v52 = vmul.f32 %v2277_v29, %v912_v48  ;;  %v856_v53 = vsel %vm853_vm3, %v855_v47, %v851_v49  ;;  %vm863_vm4 = vweird.f32 %v1598_v19  ;;  %v866_v28 = vand.u32 2147483647, %v2426_v36 }
 0x251   : > { %v859_v50 = vsub.f32 1.0, %v858_v43  ;;  %944 = vst [vmem:[%s2300_s29 + $0x8] sm:$0xff] %v928_v42  ;;  %994 = vmatmul.f32.gmra.mxu0 %v928_v42  ;;  %v937_v45 = vmul.f32 %v2273_v26, %v856_v53  ;;  %vm864_vm6 = vmor %vm862_vm5, %vm863_vm4  ;;  %v869_v29 = vor.u32 1.1754944e-38, %v868_v46 }
 0x252   : > { %957 = vst [vmem:[%s2300_s29 + $0x70] sm:$0xff] %v941_v52  ;;  %1033 = vmatmul.f32.gmra.mxu3 %v941_v52  ;;  %1015 = vmatmul.f32.gmra.mxu1 %v935_v32  ;;  %vm867_vm7 = vcmp.eq.f32.partialorder %v866_v28, 8.507059e+37 }
 0x253   : > { %v860_v55 = vmul.f32 %v1598_v19, %v859_v50  ;;  %953 = vst [vmem:[%s2300_s29 + $0x50] sm:$0xff] %v937_v45 }
 0x255   : > { %v861_v56 = vadd.f32 %v1598_v19, %v860_v55 }
 0x257   : > { %v865_v57 = vsel %vm864_vm6, %v1598_v19, %v861_v56 }
 0x258   : > { %v870_v26 = vsel %vm867_vm7, %v869_v29, %v865_v57 }
 0x259   : > { %v938_v63 = vmul.f32 %v2282_v30, %v870_v26 }
 0x25a   : > { %1018 = vmatmul.f32.gmra.mxu1 %v936_v61 }
 0x25b   : > { %954 = vst [vmem:[%s2300_s29 + $0x58] sm:$0xff] %v938_v63 }
 0x262   : > { %1021 = vmatmul.f32.gmra.mxu1 %v937_v45 }
 0x26a   : > { %1024 = vmatmul.f32.gmra.mxu1 %v938_v63 }
 0x29e   : > { %v998_v54 = vpop.f32.mrf.mxu1 }
 0x29f   : > { %1042 = vst [vmem:[%s2470_s9 + $0x10] sm:$0xff] %v998_v54 }
 0x2a4   : > { %v702_v0 = vpop.xlane.xlu2 %701 }
 0x2a5   : > { %1599 = vrcp.f32 %v702_v0  ;;  %v924_v51 = vand.u32 2147483648, %v702_v0  ;;  %v922_v6 = vand.u32 2147483647, %v702_v0  ;;  %vm918_vm9 = vweird.f32 %v702_v0 }
 0x2a6   : > { %v1001_v1 = vpop.f32.mrf.mxu1 }
 0x2a7   : > { %1043 = vst [vmem:[%s2470_s9 + $0x18] sm:$0xff] %v1001_v1  ;;  %v925_v8 = vor.u32 1.1754944e-38, %v924_v51  ;;  %vm923_vm11 = vcmp.eq.f32.partialorder %v922_v6, 8.507059e+37 }
 0x2ab   : > { %v1600_v14 = vpop.eup %1599 }
 0x2ac   : > { %v914_v12 = vmul.f32 %v1600_v14, %v702_v0  ;;  %v696_v2 = vpop.xlane.xlu1 %695  ;;  %vm919_vm8 = vweird.f32 %v1600_v14 }
 0x2ad   : > { %1601 = vrcp.f32 %v696_v2  ;;  %vm920_vm10 = vmor %vm918_vm9, %vm919_vm8  ;;  %v882_v17 = vand.u32 2147483648, %v696_v2  ;;  %v880_v20 = vand.u32 2147483647, %v696_v2  ;;  %vm876_vm13 = vweird.f32 %v696_v2 }
 0x2ae   : > { %v915_v30 = vsub.f32 1.0, %v914_v12  ;;  %v1004_v4 = vpop.f32.mrf.mxu1 }
 0x2af   : > { %1044 = vst [vmem:[%s2470_s9 + $0x20] sm:$0xff] %v1004_v4  ;;  %v883_v21 = vor.u32 1.1754944e-38, %v882_v17  ;;  %vm881_vm15 = vcmp.eq.f32.partialorder %v880_v20, 8.507059e+37 }
 0x2b0   : > { %v916_v5 = vmul.f32 %v1600_v14, %v915_v30 }
 0x2b2   : > { %v917_v3 = vadd.f32 %v1600_v14, %v916_v5 }
 0x2b3   : > { %v1602_v7 = vpop.eup %1601 }
 0x2b4   : > { %v872_v9 = vmul.f32 %v1602_v7, %v696_v2  ;;  %v921_v13 = vsel %vm920_vm10, %v1600_v14, %v917_v3  ;;  %vm877_vm12 = vweird.f32 %v1602_v7 }
 0x2b5   : > { %v926_v15 = vsel %vm923_vm11, %v925_v8, %v921_v13  ;;  %vm878_vm14 = vmor %vm876_vm13, %vm877_vm12 }
 0x2b6   : > { %v873_v16 = vsub.f32 1.0, %v872_v9  ;;  %v942_v62 = vmul.f32 %v2326_v58, %v926_v15 }
 0x2b7   : > { %v1007_v36 = vpop.f32.mrf.mxu1 }
 0x2b8   : > { %1045 = vst [vmem:[%s2470_s9 + $0x28] sm:$0xff] %v1007_v36  ;;  %v874_v10 = vmul.f32 %v1602_v7, %v873_v16  ;;  %1036 = vmatmul.f32.gmra.mxu3 %v942_v62 }
 0x2b9   : > { %958 = vst [vmem:[%s2300_s29 + $0x78] sm:$0xff] %v942_v62 }
 0x2ba   : > { %v875_v18 = vadd.f32 %v1602_v7, %v874_v10 }
 0x2bc   : > { %v1031_v11 = vpop.f32.mrf.mxu3  ;;  %v879_v58 = vsel %vm878_vm14, %v1602_v7, %v875_v18 }
 0x2bd   : > { %1053 = vst [vmem:[%s2470_s9 + $0x68] sm:$0xff] %v1031_v11  ;;  %v884_v25 = vsel %vm881_vm15, %v883_v21, %v879_v58 }
 0x2be   : > { %v939_v24 = vmul.f32 %v2355_v27, %v884_v25 }
 0x2bf   : > { %v1010_v31 = vpop.f32.mrf.mxu1 }
 0x2c0   : > { %1046 = vst [vmem:[%s2470_s9 + $0x30] sm:$0xff] %v1010_v31  ;;  %1027 = vmatmul.f32.gmra.mxu1 %v939_v24 }
 0x2c1   : > { %955 = vst [vmem:[%s2300_s29 + $0x60] sm:$0xff] %v939_v24 }
 0x2c4   : > { %v992_v60 = vpop.f32.mrf.mxu0 }
 0x2c5   : > { %1040 = vst [vmem:[%s2470_s9] sm:$0xff] %v992_v60 }
 0x2c7   : > { %v1013_v27 = vpop.f32.mrf.mxu1 }
 0x2c8   : > { %1750 = shalt.err (!%p1747_p6)
}
 0x2c9   : > { %s1889_s29 = smov 128   ;;  %s1890_s7 = smov 8   ;;  %1047 = vst [vmem:[%s2470_s9 + $0x38] sm:$0xff] %v1013_v27 }
 0x2ca   : > { %1422 = dma.vmem_to_hbm [thread:$0]  (%p2002_p8), %s1100_s24, 2048, %s1102_s10, %s1062_s25, %s1889_s29, %s1889_s29, %s1890_s7  }
 0x2cb   : > { %s2619_s8 = sld [smem:[#allocation26_spill]]  ;;  %s1078_s24 = sshll.u32 %s2470_s9, 4  ;;  %s1079_s24 = int_to_ptr.vmem [resolvable:$true] %s1078_s24 }
 0x2cc   : > { %s1057_s25 = scalar_lea.sflag [#allocation4], %s2107_s12 }
 0x2ce   : > { %v995_v32 = vpop.f32.mrf.mxu0 }
 0x2cf   : > { %1041 = vst [vmem:[%s2470_s9 + $0x8] sm:$0xff] %v995_v32  ;;  %v1016_v61 = vpop.f32.mrf.mxu1 }
 0x2d0   : > { %1048 = vst [vmem:[%s2470_s9 + $0x40] sm:$0xff] %v1016_v61 }
 0x2d1   : > { %s1077_s0 = scalar_lea.hbm %s2619_s8, %s1342_s26  ;;  %s1771_s26 = scalar_lea.hbm %s2619_s8, 1024 }
 0x2d2   : > { %s1080_s10 = sshll.u32 %s1077_s0, 4  ;;  %s1081_s10 = int_to_ptr.hbm [resolvable:$true] %s1080_s10 }
 0x2d3   : > { %s1765_s16 = sshra.s32 %s1081_s10, 4  ;;  %s1766_s16 = int_to_ptr.hbm [resolvable:$true] %s1765_s16 }
 0x2d4   : > { %s1767_s4 = scalar_lea.hbm %s1766_s16, 128  ;;  %p1772_p1 = scmp.lt.s32.totalorder %s1766_s16, %s2619_s8 }
 0x2d5   : > { %v1034_v33 = vpop.f32.mrf.mxu3  ;;  %p1768_p7 = scmp.ne.s32.totalorder %s1766_s16, %s1767_s4  ;;  %p1773_p5 = scmp.lt.s32.totalorder %s1771_s26, %s1767_s4 }
 0x2d6   : > { %1054 = vst [vmem:[%s2470_s9 + $0x70] sm:$0xff] %v1034_v33 }
 0x2d7   : > { %v1019_v34 = vpop.f32.mrf.mxu1  ;;  %p1769_p11 = pnand %p1768_p7, %p2002_p8  ;;  %p1774_p2 = por %p1773_p5, %p1772_p1 }
 0x2d8   : > { %1049 = vst [vmem:[%s2470_s9 + $0x48] sm:$0xff] %v1019_v34 }
 0x2d9   : > { %p1770_p0 = pneg %p1769_p11 }
 0x2db   : > { %p1775_p10 = pnand %p1774_p2, %p1770_p0 }
 0x2df   : > { %v1022_v35 = vpop.f32.mrf.mxu1 }
 0x2e0   : > { %1050 = vst [vmem:[%s2470_s9 + $0x50] sm:$0xff] %v1022_v35 }
 0x2e7   : > { %v1025_v40 = vpop.f32.mrf.mxu1 }
 0x2e8   : > { %1051 = vst [vmem:[%s2470_s9 + $0x58] sm:$0xff] %v1025_v40 }
 0x33b   : > { %v1037_v37 = vpop.f32.mrf.mxu3 }
 0x33c   : > { %1055 = vst [vmem:[%s2470_s9 + $0x78] sm:$0xff] %v1037_v37 }
 0x33d   : > { %v1028_v39 = vpop.f32.mrf.mxu1 }
 0x33e   : > { %1052 = vst [vmem:[%s2470_s9 + $0x60] sm:$0xff] %v1028_v39 }
 0x33f   : > { %1778 = shalt.err (!%p1775_p10)
}
 0x340   : > { %1421 = dma.vmem_to_hbm [thread:$0]  (%p2002_p8), %s1079_s24, 2048, %s1081_s10, %s1057_s25, %s1889_s29, %s1889_s29, %s1890_s7  }
 0x341 PF: > { %p1446_p12 = scmp.ge.s32.totalorder %s1885_s28, 2  ;;  %s1116_s9 = sand.u32 1, %s1857_s21  }
 0x342   : > { %s1117_s6 = scalar_lea.sflag [#allocation4], %s1116_s9 }
 0x343   : > { %p1439_p13 = pnand %p1446_p12, %p2009_p9 }
 0x345   : > { %p1440_p3 = pneg %p1439_p13 }
 0x347   : > { %1836 = dma.done.wait (%p1440_p3), %s1117_s6, 2048  }
 0x348   : > { %1838 = vsyncadd (%p1440_p3), %s1117_s6, 4294965248  ;;  %s1127_s5 = scalar_lea.sflag [#allocation12], %s1116_s9 }
 0x349   : > { %1840 = dma.done.wait (%p1440_p3), %s1127_s5, 2048  }
 0x34a   : > { %1842 = vsyncadd (%p1440_p3), %s1127_s5, 4294965248  ;;  %s31_s28 = sadd.s32 1, %s1885_s28   ;;  %s2621_s11 = sld [smem:[#allocation18_spill]] }
 0x34b   : > { %p28_p4 = scmp.ge.s32.totalorder %s31_s28, 10   ;;  %s2622_s23 = sld [smem:[#allocation23_spill]] }
 0x34c   : > { %s2623_s24 = sld [smem:[#allocation19_spill]]  ;;  %s2626_s18 = smov %s1849_s19 }
 0x34d   : > { %s2624_s26 = sld [smem:[#allocation20_spill]]  ;;  %s2627_s19 = smov %s1853_s20 }
 0x34e   : > { %s2625_s29 = sld [smem:[#allocation21_spill]]  ;;  %s2628_s20 = smov %s2075_s14 }
 0x34f   : > { %s2629_s21 = smov %s1861_s22  ;;  %s2631_s25 = smov %s1881_s27 }
 0x350   : > { %s2630_s22 = smov %s2621_s11  ;;  %30 = sbr.rel (!%p28_p4) target bundleno = 20 (0x14), region = 135 }
 0x354   : > { %s2632_s27 = smov %s2625_s29 }
 0x355   :  { %1133 = vsyncpa [#allocation3], 1 }
 0x356   :  { %1135 = vsyncpa [#allocation3 + $0x1], 1 }
 0x357   :  { %1136 = vsyncpa [#allocation6], 1 }
 0x358   :  { %1138 = vsyncpa [#allocation6 + $0x1], 1 }
 0x359   :  { %1139 = vsyncpa [#allocation9], 1 }
 0x35a   :  { %1141 = vsyncpa [#allocation9 + $0x1], 1 }
 0x35b   :  { %1142 = vsyncpa [#allocation4], 1 }
 0x35c   :  { %1144 = vsyncpa [#allocation4 + $0x1], 1 }
 0x35d   :  { %1145 = vsyncpa [#allocation12], 1 }
 0x35e   :  { %1147 = vsyncpa [#allocation12 + $0x1], 1 }

</bundles_post_ra>
